<compile_context>
chip_gen: v7x
topology: tpu7x:2x2x1
jax: 0.10.0
libtpu: 0.0.40
codegen_flags: <defaults>
</compile_context>

<pallas_src>
import jax
import jax.numpy as jnp
from jax.experimental import pallas as pl
from jax.experimental.pallas import tpu as pltpu

LEAK = 0.2                      # LeakyReLU negative slope
BN_EPS = 1e-5                   # nn.BatchNorm2d default eps
KSIZE, STRIDE, PAD = 4, 2, 1
LANE = 128                      # TPU lane width: channel dims padded to this
TM_CAP = 4096                   # absolute row-tile ceiling (multiple of 16)
ROW_VMEM_BUDGET = 8 * 1024 * 1024   # budget for double-buffered per-row streams

_CPARAMS = pltpu.CompilerParams(
    dimension_semantics=("parallel",),
    # Re-derived against v7x's smaller VMEM (64 MiB physical): the row-stream
    # budget above plus the (un-tiled) weight block stays well under this.
    vmem_limit_bytes=48 * 1024 * 1024,
)


# --------------------------------------------------------------------------- helpers
def _round_up(a, b):
    return ((a + b - 1) // b) * b


def _row_tiling(M, K, Cout):
    """Row tile TM (multiple of 16) and padded row count M_pad.

    Sized so that 2 pipeline buffers x (bf16 patches + bf16 output) per row
    fit the VMEM budget, and split into >= 2 grid steps whenever possible so
    both v7x TensorCores receive work under dimension_semantics=("parallel",).
    """
    bytes_per_row = 2 * (K * 2 + Cout * 2)
    tm_cap = max(64, min(TM_CAP, (ROW_VMEM_BUDGET // bytes_per_row) // 16 * 16))
    M16 = _round_up(max(M, 1), 16)
    if M16 <= 16:
        return 16, 16                                   # too small to split
    if M16 <= 2 * tm_cap:
        TM = _round_up(-(-M16 // 2), 16)                # exactly two tiles
    else:
        TM = tm_cap
    return TM, _round_up(M16, TM)


def _pad_rows(a, M_pad):
    M = a.shape[0]
    if M_pad == M:
        return a
    return jnp.pad(a, ((0, M_pad - M), (0, 0)))         # zero rows: BN-stat neutral


# --------------------------------------------------------------------------- conv kernels
def _conv_bias_act_kernel(p_ref, w_ref, b_ref, y_ref):
    # (TM, K) @ (K, Cout_pad) on the MXU (bf16 operands, f32 accumulate),
    # + bias + LeakyReLU(0.2) fused epilogue, bf16 lane-dense store.
    acc = jnp.dot(p_ref[...], w_ref[...], preferred_element_type=jnp.float32)
    z = acc + b_ref[...]
    y_ref[...] = jnp.where(z >= 0.0, z, LEAK * z).astype(y_ref.dtype)


def conv_bias_act(patches, w, b, TM):
    M_pad, K = patches.shape
    Cout = w.shape[1]
    return pl.pallas_call(
        _conv_bias_act_kernel,
        grid=(M_pad // TM,),
        in_specs=[pl.BlockSpec((TM, K), lambda i: (i, 0)),
                  pl.BlockSpec((K, Cout), lambda i: (0, 0)),
                  pl.BlockSpec((1, Cout), lambda i: (0, 0))],
        out_specs=pl.BlockSpec((TM, Cout), lambda i: (i, 0)),
        out_shape=jax.ShapeDtypeStruct((M_pad, Cout), jnp.bfloat16),
        compiler_params=_CPARAMS,
    )(patches, w, b)


def _conv_stats_kernel(p_ref, w_ref, y_ref, stats_ref):
    # Conv matmul tile (bf16 store) + per-tile channel sum / sum-of-squares
    # from the f32 accumulator, written with two direct sub-block stores.
    acc = jnp.dot(p_ref[...], w_ref[...], preferred_element_type=jnp.float32)
    y_ref[...] = acc.astype(y_ref.dtype)
    stats_ref[0, 0:1, :] = jnp.sum(acc, axis=0, keepdims=True)
    stats_ref[0, 1:2, :] = jnp.sum(acc * acc, axis=0, keepdims=True)


def conv_stats(patches, w, TM):
    M_pad, K = patches.shape
    Cout = w.shape[1]
    nt = M_pad // TM
    return pl.pallas_call(
        _conv_stats_kernel,
        grid=(nt,),
        in_specs=[pl.BlockSpec((TM, K), lambda i: (i, 0)),
                  pl.BlockSpec((K, Cout), lambda i: (0, 0))],
        out_specs=(pl.BlockSpec((TM, Cout), lambda i: (i, 0)),
                   pl.BlockSpec((1, 2, Cout), lambda i: (i, 0, 0))),
        out_shape=(jax.ShapeDtypeStruct((M_pad, Cout), jnp.bfloat16),
                   jax.ShapeDtypeStruct((nt, 2, Cout), jnp.float32)),
        compiler_params=_CPARAMS,
    )(patches, w)


# --------------------------------------------------------------------------- BN + act kernel
def _bn_act_kernel(y_ref, s_ref, b_ref, o_ref):
    # Pure FMA + LeakyReLU stream: per-channel scale/shift were finalized
    # outside the tiled loop (no per-step stats reduction / rsqrt here).
    z = y_ref[...].astype(jnp.float32) * s_ref[...] + b_ref[...]
    o_ref[...] = jnp.where(z >= 0.0, z, LEAK * z).astype(o_ref.dtype)


def bn_act(y, scale, shift, TM):
    M_pad, C = y.shape
    return pl.pallas_call(
        _bn_act_kernel,
        grid=(M_pad // TM,),
        in_specs=[pl.BlockSpec((TM, C), lambda i: (i, 0)),
                  pl.BlockSpec((1, C), lambda i: (0, 0)),
                  pl.BlockSpec((1, C), lambda i: (0, 0))],
        out_specs=pl.BlockSpec((TM, C), lambda i: (i, 0)),
        out_shape=jax.ShapeDtypeStruct((M_pad, C), jnp.bfloat16),
        compiler_params=_CPARAMS,
    )(y, scale, shift)


# --------------------------------------------------------------------------- head kernel
def _head_kernel(x_ref, w_ref, b_ref, o_ref):
    # Linear(F -> 1) as elementwise multiply + lane reduction (avoids a
    # 1-wide MXU matmul), + Sigmoid. F is lane-dense (multiple of 128).
    z = jnp.sum(x_ref[...].astype(jnp.float32) * w_ref[...],
                axis=-1, keepdims=True) + b_ref[...]
    o_ref[...] = jax.nn.sigmoid(z)


def head(feat, w_row, b):
    # TODO(synk): tile over N (multiples of 8 rows) or fuse into the layer-4
    # bn_act epilogue for large training batches; at N=2 a single block is fine.
    N, F = feat.shape
    return pl.pallas_call(
        _head_kernel,
        grid=(1,),
        in_specs=[pl.BlockSpec((N, F), lambda i: (0, 0)),
                  pl.BlockSpec((1, F), lambda i: (0, 0)),
                  pl.BlockSpec((1, 1), lambda i: (0, 0))],
        out_specs=pl.BlockSpec((N, 1), lambda i: (0, 0)),
        out_shape=jax.ShapeDtypeStruct((N, 1), jnp.float32),
    )(feat, w_row, b)


# --------------------------------------------------------------------------- glue
def _im2col(x_nhwc):
    """k=4, s=2, p=1 patches. Returns (N*OH*OW, KH*KW*Cin), OH, OW (bf16 in/out)."""
    N, H, W, C = x_nhwc.shape
    xp = jnp.pad(x_nhwc, ((0, 0), (PAD, PAD), (PAD, PAD), (0, 0)))
    OH = (H + 2 * PAD - KSIZE) // STRIDE + 1
    OW = (W + 2 * PAD - KSIZE) // STRIDE + 1
    taps = []
    for i in range(KSIZE):
        for j in range(KSIZE):
            taps.append(xp[:, i:i + STRIDE * OH:STRIDE, j:j + STRIDE * OW:STRIDE, :])
    pat = jnp.stack(taps, axis=3)                       # (N, OH, OW, k*k, Cin)
    return pat.reshape(N * OH * OW, KSIZE * KSIZE * C), OH, OW


def _downsample(x_nhwc, w_pt, bias=None, bn=None):
    """One Downsample block. w_pt: (Cout, Cin_true, KH, KW) (PyTorch layout).

    x_nhwc may carry lane-padded channels; the matching weight rows are
    zero-padded so the padded channels stay exactly zero through the layer.
    """
    N = x_nhwc.shape[0]
    Cin = x_nhwc.shape[-1]                              # possibly lane-padded
    Cout, Cin_true = w_pt.shape[0], w_pt.shape[1]
    Cout_pad = _round_up(Cout, LANE)

    patches, OH, OW = _im2col(x_nhwc)                   # bf16 patches
    M, K = patches.shape
    TM, M_pad = _row_tiling(M, K, Cout_pad)
    patches = _pad_rows(patches, M_pad)

    # (Cout, Cin_true, KH, KW) -> (KH, KW, Cin_pad, Cout_pad) -> (K, Cout_pad)
    # so the contraction order matches the (kh, kw, cin) patch flattening.
    wm = jnp.transpose(w_pt, (2, 3, 1, 0))
    wm = jnp.pad(wm, ((0, 0), (0, 0), (0, Cin - Cin_true), (0, Cout_pad - Cout)))
    wm = wm.reshape(KSIZE * KSIZE * Cin, Cout_pad).astype(jnp.bfloat16)

    if bn is None:
        b = jnp.pad(bias.astype(jnp.float32), (0, Cout_pad - Cout)).reshape(1, Cout_pad)
        y = conv_bias_act(patches, wm, b, TM)
    else:
        y, stats = conv_stats(patches, wm, TM)
        gamma, beta = bn
        gamma = jnp.pad(gamma.astype(jnp.float32), (0, Cout_pad - Cout))
        beta = jnp.pad(beta.astype(jnp.float32), (0, Cout_pad - Cout))
        # Hoisted BN finalization (tiny per-channel op): training-mode batch
        # stats from the f32 partial sums, biased variance, clamped at 0.
        tot = jnp.sum(stats, axis=0)                    # (2, Cout_pad)
        inv_m = 1.0 / float(M)
        mean = tot[0] * inv_m
        var = jnp.maximum(tot[1] * inv_m - mean * mean, 0.0)
        scale = gamma * jax.lax.rsqrt(var + BN_EPS)     # padded ch: gamma=0 -> 0
        shift = beta - mean * scale
        y = bn_act(y, scale.reshape(1, Cout_pad), shift.reshape(1, Cout_pad), TM)
    return y[:M].reshape(N, OH, OW, Cout_pad)


def discriminator_forward(x_nchw, params):
    # NCHW -> NHWC, bf16 MXU operands (halves im2col / patch HBM traffic).
    x = jnp.transpose(x_nchw, (0, 2, 3, 1)).astype(jnp.bfloat16)
    N = x.shape[0]
    h = _downsample(x, params["w1"], bias=params["b1"], bn=None)
    h = _downsample(h, params["w2"], bn=(params["g2"], params["be2"]))
    h = _downsample(h, params["w3"], bn=(params["g3"], params["be3"]))
    h = _downsample(h, params["w4"], bn=(params["g4"], params["be4"]))
    _, OH, OW, C4_pad = h.shape
    C4 = params["wl"].shape[0] // (OH * OW)             # true channel count
    # PyTorch flattens in NCHW order; fold that permutation (and the lane
    # padding) into the linear-weight rows instead of transposing activations.
    w3d = params["wl"][:, 0].reshape(C4, OH, OW)
    w3d = jnp.pad(w3d, ((0, C4_pad - C4), (0, 0), (0, 0)))
    wl_row = jnp.transpose(w3d, (1, 2, 0)).reshape(1, OH * OW * C4_pad)
    feat = h.reshape(N, OH * OW * C4_pad)
    return head(feat, wl_row, params["bl"].reshape(1, 1))


# --------------------------------------------------------------------------- params
def init_params(key, channel_size, image_size):
    """DCGAN-style weights_init: conv/linear ~ N(0, 0.02), BN gamma ~ N(1, 0.02)."""
    C = channel_size
    ks = jax.random.split(key, 8)

    def conv_w(k, cout, cin):
        return 0.02 * jax.random.normal(k, (cout, cin, KSIZE, KSIZE), jnp.float32)

    affine_in = 8 * C * (image_size // 16) * (image_size // 16)
    return {
        "w1": conv_w(ks[0], C, 3),
        "b1": jnp.zeros((C,), jnp.float32),
        "w2": conv_w(ks[1], 2 * C, C),
        "g2": 1.0 + 0.02 * jax.random.normal(ks[2], (2 * C,), jnp.float32),
        "be2": jnp.zeros((2 * C,), jnp.float32),
        "w3": conv_w(ks[3], 4 * C, 2 * C),
        "g3": 1.0 + 0.02 * jax.random.normal(ks[4], (4 * C,), jnp.float32),
        "be3": jnp.zeros((4 * C,), jnp.float32),
        "w4": conv_w(ks[5], 8 * C, 4 * C),
        "g4": 1.0 + 0.02 * jax.random.normal(ks[6], (8 * C,), jnp.float32),
        "be4": jnp.zeros((8 * C,), jnp.float32),
        "wl": 0.02 * jax.random.normal(ks[7], (affine_in, 1), jnp.float32),
        "bl": jnp.zeros((1,), jnp.float32),
    }


# --------------------------------------------------------------------------- main
if __name__ == "__main__":
    image_size, channel_size, batch = 16, 4, 2
    key = jax.random.PRNGKey(0)
    kx, kp = jax.random.split(key)

    x = jax.random.normal(kx, (batch, 3, image_size, image_size), jnp.float32)
    params = init_params(kp, channel_size, image_size)

    fwd = jax.jit(discriminator_forward)
    out = fwd(x, params)
    out = jax.block_until_ready(out)

    assert out.shape == (batch, 1), out.shape
    assert bool(jnp.all(jnp.isfinite(out)))
    assert bool(jnp.all((out > 0.0) & (out < 1.0)))     # sigmoid range
    print("KERNEL_OK")
</pallas_src>

<mosaic_0001>
module attributes {stable_mosaic.version = 11 : i64} {
  func.func @_conv_bias_act_kernel(%arg0: i32, %arg1: memref<64x48xbf16, #tpu.memory_space<vmem>>, %arg2: memref<48x128xbf16, #tpu.memory_space<vmem>>, %arg3: memref<1x128xf32, #tpu.memory_space<vmem>>, %arg4: memref<64x128xbf16, #tpu.memory_space<vmem>>) attributes {dimension_semantics = [#tpu.dimension_semantics<parallel>], iteration_bounds = array<i64: 2>, scalar_prefetch = 0 : i64, scratch_operands = 0 : i64, tpu.core_type = #tpu.core_type<tc>, window_params = [{transform_indices = @transform_0, window_bounds = array<i64: 64, 48>}, {pipeline_mode = #tpu.pipeline_mode<synchronous>, transform_indices = @transform_1, window_bounds = array<i64: 48, 128>}, {pipeline_mode = #tpu.pipeline_mode<synchronous>, transform_indices = @transform_2, window_bounds = array<i64: 1, 128>}, {transform_indices = @transform_3, window_bounds = array<i64: 64, 128>}]} {
    %c0 = arith.constant 0 : index
    %c0_0 = arith.constant 0 : index
    %0 = vector.load %arg1[%c0, %c0_0] : memref<64x48xbf16, #tpu.memory_space<vmem>>, vector<64x48xbf16>
    %c0_1 = arith.constant 0 : index
    %c0_2 = arith.constant 0 : index
    %1 = vector.load %arg2[%c0_1, %c0_2] : memref<48x128xbf16, #tpu.memory_space<vmem>>, vector<48x128xbf16>
    %cst = arith.constant dense<0.000000e+00> : vector<64x128xf32>
    %2 = tpu.matmul %0, %1, %cst {dimension_numbers = #tpu.dot_dimension_numbers<[1], [0], [0], [1], [0, 0, 1, 1], [], []>} : vector<64x48xbf16>, vector<48x128xbf16>, vector<64x128xf32> -> vector<64x128xf32>
    %c0_3 = arith.constant 0 : index
    %c0_4 = arith.constant 0 : index
    %3 = vector.load %arg3[%c0_3, %c0_4] : memref<1x128xf32, #tpu.memory_space<vmem>>, vector<1x128xf32>
    %4 = vector.broadcast %3 : vector<1x128xf32> to vector<64x128xf32>
    %5 = arith.addf %2, %4 : vector<64x128xf32>
    %cst_5 = arith.constant 0.000000e+00 : f32
    %6 = vector.broadcast %cst_5 : f32 to vector<64x128xf32>
    %7 = arith.cmpf oge, %5, %6 : vector<64x128xf32>
    %cst_6 = arith.constant 2.000000e-01 : f32
    %8 = vector.broadcast %cst_6 : f32 to vector<64x128xf32>
    %9 = arith.mulf %8, %5 : vector<64x128xf32>
    %10 = arith.select %7, %5, %9 : vector<64x128xi1>, vector<64x128xf32>
    %11 = arith.truncf %10 : vector<64x128xf32> to vector<64x128xbf16>
    %c0_7 = arith.constant 0 : index
    %c0_8 = arith.constant 0 : index
    %12 = vector.load %arg4[%c0_7, %c0_8] : memref<64x128xbf16, #tpu.memory_space<vmem>>, vector<64x128xbf16>
    tpu.vector_store %arg4[%c0_7, %c0_8], %11 {strides = array<i32>} : memref<64x128xbf16, #tpu.memory_space<vmem>>, vector<64x128xbf16>,
    return
  }
  func.func @transform_0(%arg0: i32) -> (i32, i32) {
    %c0_i32 = arith.constant 0 : i32
    %c0_i32_0 = arith.constant 0 : i32
    return %arg0, %c0_i32 : i32, i32
  }
  func.func @transform_1(%arg0: i32) -> (i32, i32) {
    %c0_i32 = arith.constant 0 : i32
    %c0_i32_0 = arith.constant 0 : i32
    %c0_i32_1 = arith.constant 0 : i32
    return %c0_i32, %c0_i32_0 : i32, i32
  }
  func.func @transform_2(%arg0: i32) -> (i32, i32) {
    %c0_i32 = arith.constant 0 : i32
    %c0_i32_0 = arith.constant 0 : i32
    %c0_i32_1 = arith.constant 0 : i32
    return %c0_i32, %c0_i32_0 : i32, i32
  }
  func.func @transform_3(%arg0: i32) -> (i32, i32) {
    %c0_i32 = arith.constant 0 : i32
    %c0_i32_0 = arith.constant 0 : i32
    return %arg0, %c0_i32 : i32, i32
  }
}

module attributes {stable_mosaic.version = 11 : i64} {
  func.func @_conv_stats_kernel(%arg0: i32, %arg1: memref<16x2048xbf16, #tpu.memory_space<vmem>>, %arg2: memref<2048x128xbf16, #tpu.memory_space<vmem>>, %arg3: memref<16x128xbf16, #tpu.memory_space<vmem>>, %arg4: memref<1x2x128xf32, #tpu.memory_space<vmem>>) attributes {dimension_semantics = [#tpu.dimension_semantics<parallel>], iteration_bounds = array<i64: 2>, scalar_prefetch = 0 : i64, scratch_operands = 0 : i64, tpu.core_type = #tpu.core_type<tc>, window_params = [{transform_indices = @transform_0, window_bounds = array<i64: 16, 2048>}, {pipeline_mode = #tpu.pipeline_mode<synchronous>, transform_indices = @transform_1, window_bounds = array<i64: 2048, 128>}, {transform_indices = @transform_2, window_bounds = array<i64: 16, 128>}, {transform_indices = @transform_3, window_bounds = array<i64: 1, 2, 128>}]} {
    %c0 = arith.constant 0 : index
    %c0_0 = arith.constant 0 : index
    %0 = vector.load %arg1[%c0, %c0_0] : memref<16x2048xbf16, #tpu.memory_space<vmem>>, vector<16x2048xbf16>
    %c0_1 = arith.constant 0 : index
    %c0_2 = arith.constant 0 : index
    %1 = vector.load %arg2[%c0_1, %c0_2] : memref<2048x128xbf16, #tpu.memory_space<vmem>>, vector<2048x128xbf16>
    %cst = arith.constant dense<0.000000e+00> : vector<16x128xf32>
    %2 = tpu.matmul %0, %1, %cst {dimension_numbers = #tpu.dot_dimension_numbers<[1], [0], [0], [1], [0, 0, 1, 1], [], []>} : vector<16x2048xbf16>, vector<2048x128xbf16>, vector<16x128xf32> -> vector<16x128xf32>
    %3 = arith.truncf %2 : vector<16x128xf32> to vector<16x128xbf16>
    %c0_3 = arith.constant 0 : index
    %c0_4 = arith.constant 0 : index
    %4 = vector.load %arg3[%c0_3, %c0_4] : memref<16x128xbf16, #tpu.memory_space<vmem>>, vector<16x128xbf16>
    tpu.vector_store %arg3[%c0_3, %c0_4], %3 {strides = array<i32>} : memref<16x128xbf16, #tpu.memory_space<vmem>>, vector<16x128xbf16>,
    %cst_5 = arith.constant dense<0.000000e+00> : vector<128xf32>
    %5 = vector.multi_reduction <add>, %2, %cst_5 [0] : vector<16x128xf32> to vector<128xf32>
    %6 = vector.shape_cast %5 : vector<128xf32> to vector<1x128xf32>
    %c0_6 = arith.constant 0 : index
    %c0_7 = arith.constant 0 : index
    %c0_8 = arith.constant 0 : index
    %7 = vector.load %arg4[%c0_6, %c0_7, %c0_8] : memref<1x2x128xf32, #tpu.memory_space<vmem>>, vector<1x1x128xf32>
    %8 = vector.shape_cast %7 : vector<1x1x128xf32> to vector<1x128xf32>
    %9 = vector.shape_cast %6 : vector<1x128xf32> to vector<1x1x128xf32>
    tpu.vector_store %arg4[%c0_6, %c0_7, %c0_8], %9 {strides = array<i32>} : memref<1x2x128xf32, #tpu.memory_space<vmem>>, vector<1x1x128xf32>,
    %10 = arith.mulf %2, %2 : vector<16x128xf32>
    %cst_9 = arith.constant dense<0.000000e+00> : vector<128xf32>
    %11 = vector.multi_reduction <add>, %10, %cst_9 [0] : vector<16x128xf32> to vector<128xf32>
    %12 = vector.shape_cast %11 : vector<128xf32> to vector<1x128xf32>
    %c0_10 = arith.constant 0 : index
    %c1 = arith.constant 1 : index
    %c0_11 = arith.constant 0 : index
    %13 = vector.load %arg4[%c0_10, %c1, %c0_11] : memref<1x2x128xf32, #tpu.memory_space<vmem>>, vector<1x1x128xf32>
    %14 = vector.shape_cast %13 : vector<1x1x128xf32> to vector<1x128xf32>
    %15 = vector.shape_cast %12 : vector<1x128xf32> to vector<1x1x128xf32>
    tpu.vector_store %arg4[%c0_10, %c1, %c0_11], %15 {strides = array<i32>} : memref<1x2x128xf32, #tpu.memory_space<vmem>>, vector<1x1x128xf32>,
    return
  }
  func.func @transform_0(%arg0: i32) -> (i32, i32) {
    %c0_i32 = arith.constant 0 : i32
    %c0_i32_0 = arith.constant 0 : i32
    return %arg0, %c0_i32 : i32, i32
  }
  func.func @transform_1(%arg0: i32) -> (i32, i32) {
    %c0_i32 = arith.constant 0 : i32
    %c0_i32_0 = arith.constant 0 : i32
    %c0_i32_1 = arith.constant 0 : i32
    return %c0_i32, %c0_i32_0 : i32, i32
  }
  func.func @transform_2(%arg0: i32) -> (i32, i32) {
    %c0_i32 = arith.constant 0 : i32
    %c0_i32_0 = arith.constant 0 : i32
    return %arg0, %c0_i32 : i32, i32
  }
  func.func @transform_3(%arg0: i32) -> (i32, i32, i32) {
    %c0_i32 = arith.constant 0 : i32
    %c0_i32_0 = arith.constant 0 : i32
    %c0_i32_1 = arith.constant 0 : i32
    return %arg0, %c0_i32, %c0_i32_0 : i32, i32, i32
  }
}

module attributes {stable_mosaic.version = 11 : i64} {
  func.func @_bn_act_kernel(%arg0: i32, %arg1: memref<16x128xbf16, #tpu.memory_space<vmem>>, %arg2: memref<1x128xf32, #tpu.memory_space<vmem>>, %arg3: memref<1x128xf32, #tpu.memory_space<vmem>>, %arg4: memref<16x128xbf16, #tpu.memory_space<vmem>>) attributes {dimension_semantics = [#tpu.dimension_semantics<parallel>], iteration_bounds = array<i64: 2>, scalar_prefetch = 0 : i64, scratch_operands = 0 : i64, tpu.core_type = #tpu.core_type<tc>, window_params = [{transform_indices = @transform_0, window_bounds = array<i64: 16, 128>}, {pipeline_mode = #tpu.pipeline_mode<synchronous>, transform_indices = @transform_1, window_bounds = array<i64: 1, 128>}, {pipeline_mode = #tpu.pipeline_mode<synchronous>, transform_indices = @transform_2, window_bounds = array<i64: 1, 128>}, {transform_indices = @transform_3, window_bounds = array<i64: 16, 128>}]} {
    %c0 = arith.constant 0 : index
    %c0_0 = arith.constant 0 : index
    %0 = vector.load %arg1[%c0, %c0_0] : memref<16x128xbf16, #tpu.memory_space<vmem>>, vector<16x128xbf16>
    %1 = arith.extf %0 : vector<16x128xbf16> to vector<16x128xf32>
    %c0_1 = arith.constant 0 : index
    %c0_2 = arith.constant 0 : index
    %2 = vector.load %arg2[%c0_1, %c0_2] : memref<1x128xf32, #tpu.memory_space<vmem>>, vector<1x128xf32>
    %3 = vector.broadcast %2 : vector<1x128xf32> to vector<16x128xf32>
    %4 = arith.mulf %1, %3 : vector<16x128xf32>
    %c0_3 = arith.constant 0 : index
    %c0_4 = arith.constant 0 : index
    %5 = vector.load %arg3[%c0_3, %c0_4] : memref<1x128xf32, #tpu.memory_space<vmem>>, vector<1x128xf32>
    %6 = vector.broadcast %5 : vector<1x128xf32> to vector<16x128xf32>
    %7 = arith.addf %4, %6 : vector<16x128xf32>
    %cst = arith.constant 0.000000e+00 : f32
    %8 = vector.broadcast %cst : f32 to vector<16x128xf32>
    %9 = arith.cmpf oge, %7, %8 : vector<16x128xf32>
    %cst_5 = arith.constant 2.000000e-01 : f32
    %10 = vector.broadcast %cst_5 : f32 to vector<16x128xf32>
    %11 = arith.mulf %10, %7 : vector<16x128xf32>
    %12 = arith.select %9, %7, %11 : vector<16x128xi1>, vector<16x128xf32>
    %13 = arith.truncf %12 : vector<16x128xf32> to vector<16x128xbf16>
    %c0_6 = arith.constant 0 : index
    %c0_7 = arith.constant 0 : index
    %14 = vector.load %arg4[%c0_6, %c0_7] : memref<16x128xbf16, #tpu.memory_space<vmem>>, vector<16x128xbf16>
    tpu.vector_store %arg4[%c0_6, %c0_7], %13 {strides = array<i32>} : memref<16x128xbf16, #tpu.memory_space<vmem>>, vector<16x128xbf16>,
    return
  }
  func.func @transform_0(%arg0: i32) -> (i32, i32) {
    %c0_i32 = arith.constant 0 : i32
    %c0_i32_0 = arith.constant 0 : i32
    return %arg0, %c0_i32 : i32, i32
  }
  func.func @transform_1(%arg0: i32) -> (i32, i32) {
    %c0_i32 = arith.constant 0 : i32
    %c0_i32_0 = arith.constant 0 : i32
    %c0_i32_1 = arith.constant 0 : i32
    return %c0_i32, %c0_i32_0 : i32, i32
  }
  func.func @transform_2(%arg0: i32) -> (i32, i32) {
    %c0_i32 = arith.constant 0 : i32
    %c0_i32_0 = arith.constant 0 : i32
    %c0_i32_1 = arith.constant 0 : i32
    return %c0_i32, %c0_i32_0 : i32, i32
  }
  func.func @transform_3(%arg0: i32) -> (i32, i32) {
    %c0_i32 = arith.constant 0 : i32
    %c0_i32_0 = arith.constant 0 : i32
    return %arg0, %c0_i32 : i32, i32
  }
}

module attributes {stable_mosaic.version = 11 : i64} {
  func.func @_bn_act_kernel(%arg0: i32, %arg1: memref<16x128xbf16, #tpu.memory_space<vmem>>, %arg2: memref<1x128xf32, #tpu.memory_space<vmem>>, %arg3: memref<1x128xf32, #tpu.memory_space<vmem>>, %arg4: memref<16x128xbf16, #tpu.memory_space<vmem>>) attributes {dimension_semantics = [#tpu.dimension_semantics<parallel>], iteration_bounds = array<i64: 1>, scalar_prefetch = 0 : i64, scratch_operands = 0 : i64, tpu.core_type = #tpu.core_type<tc>, window_params = [{transform_indices = @transform_0, window_bounds = array<i64: 16, 128>}, {pipeline_mode = #tpu.pipeline_mode<synchronous>, transform_indices = @transform_1, window_bounds = array<i64: 1, 128>}, {pipeline_mode = #tpu.pipeline_mode<synchronous>, transform_indices = @transform_2, window_bounds = array<i64: 1, 128>}, {transform_indices = @transform_3, window_bounds = array<i64: 16, 128>}]} {
    %c0 = arith.constant 0 : index
    %c0_0 = arith.constant 0 : index
    %0 = vector.load %arg1[%c0, %c0_0] : memref<16x128xbf16, #tpu.memory_space<vmem>>, vector<16x128xbf16>
    %1 = arith.extf %0 : vector<16x128xbf16> to vector<16x128xf32>
    %c0_1 = arith.constant 0 : index
    %c0_2 = arith.constant 0 : index
    %2 = vector.load %arg2[%c0_1, %c0_2] : memref<1x128xf32, #tpu.memory_space<vmem>>, vector<1x128xf32>
    %3 = vector.broadcast %2 : vector<1x128xf32> to vector<16x128xf32>
    %4 = arith.mulf %1, %3 : vector<16x128xf32>
    %c0_3 = arith.constant 0 : index
    %c0_4 = arith.constant 0 : index
    %5 = vector.load %arg3[%c0_3, %c0_4] : memref<1x128xf32, #tpu.memory_space<vmem>>, vector<1x128xf32>
    %6 = vector.broadcast %5 : vector<1x128xf32> to vector<16x128xf32>
    %7 = arith.addf %4, %6 : vector<16x128xf32>
    %cst = arith.constant 0.000000e+00 : f32
    %8 = vector.broadcast %cst : f32 to vector<16x128xf32>
    %9 = arith.cmpf oge, %7, %8 : vector<16x128xf32>
    %cst_5 = arith.constant 2.000000e-01 : f32
    %10 = vector.broadcast %cst_5 : f32 to vector<16x128xf32>
    %11 = arith.mulf %10, %7 : vector<16x128xf32>
    %12 = arith.select %9, %7, %11 : vector<16x128xi1>, vector<16x128xf32>
    %13 = arith.truncf %12 : vector<16x128xf32> to vector<16x128xbf16>
    %c0_6 = arith.constant 0 : index
    %c0_7 = arith.constant 0 : index
    %14 = vector.load %arg4[%c0_6, %c0_7] : memref<16x128xbf16, #tpu.memory_space<vmem>>, vector<16x128xbf16>
    tpu.vector_store %arg4[%c0_6, %c0_7], %13 {strides = array<i32>} : memref<16x128xbf16, #tpu.memory_space<vmem>>, vector<16x128xbf16>,
    return
  }
  func.func @transform_0(%arg0: i32) -> (i32, i32) {
    %c0_i32 = arith.constant 0 : i32
    %c0_i32_0 = arith.constant 0 : i32
    return %arg0, %c0_i32 : i32, i32
  }
  func.func @transform_1(%arg0: i32) -> (i32, i32) {
    %c0_i32 = arith.constant 0 : i32
    %c0_i32_0 = arith.constant 0 : i32
    %c0_i32_1 = arith.constant 0 : i32
    return %c0_i32, %c0_i32_0 : i32, i32
  }
  func.func @transform_2(%arg0: i32) -> (i32, i32) {
    %c0_i32 = arith.constant 0 : i32
    %c0_i32_0 = arith.constant 0 : i32
    %c0_i32_1 = arith.constant 0 : i32
    return %c0_i32, %c0_i32_0 : i32, i32
  }
  func.func @transform_3(%arg0: i32) -> (i32, i32) {
    %c0_i32 = arith.constant 0 : i32
    %c0_i32_0 = arith.constant 0 : i32
    return %arg0, %c0_i32 : i32, i32
  }
}

module attributes {stable_mosaic.version = 11 : i64} {
  func.func @_conv_stats_kernel(%arg0: i32, %arg1: memref<16x2048xbf16, #tpu.memory_space<vmem>>, %arg2: memref<2048x128xbf16, #tpu.memory_space<vmem>>, %arg3: memref<16x128xbf16, #tpu.memory_space<vmem>>, %arg4: memref<1x2x128xf32, #tpu.memory_space<vmem>>) attributes {dimension_semantics = [#tpu.dimension_semantics<parallel>], iteration_bounds = array<i64: 1>, scalar_prefetch = 0 : i64, scratch_operands = 0 : i64, tpu.core_type = #tpu.core_type<tc>, window_params = [{transform_indices = @transform_0, window_bounds = array<i64: 16, 2048>}, {pipeline_mode = #tpu.pipeline_mode<synchronous>, transform_indices = @transform_1, window_bounds = array<i64: 2048, 128>}, {transform_indices = @transform_2, window_bounds = array<i64: 16, 128>}, {transform_indices = @transform_3, window_bounds = array<i64: 1, 2, 128>}]} {
    %c0 = arith.constant 0 : index
    %c0_0 = arith.constant 0 : index
    %0 = vector.load %arg1[%c0, %c0_0] : memref<16x2048xbf16, #tpu.memory_space<vmem>>, vector<16x2048xbf16>
    %c0_1 = arith.constant 0 : index
    %c0_2 = arith.constant 0 : index
    %1 = vector.load %arg2[%c0_1, %c0_2] : memref<2048x128xbf16, #tpu.memory_space<vmem>>, vector<2048x128xbf16>
    %cst = arith.constant dense<0.000000e+00> : vector<16x128xf32>
    %2 = tpu.matmul %0, %1, %cst {dimension_numbers = #tpu.dot_dimension_numbers<[1], [0], [0], [1], [0, 0, 1, 1], [], []>} : vector<16x2048xbf16>, vector<2048x128xbf16>, vector<16x128xf32> -> vector<16x128xf32>
    %3 = arith.truncf %2 : vector<16x128xf32> to vector<16x128xbf16>
    %c0_3 = arith.constant 0 : index
    %c0_4 = arith.constant 0 : index
    %4 = vector.load %arg3[%c0_3, %c0_4] : memref<16x128xbf16, #tpu.memory_space<vmem>>, vector<16x128xbf16>
    tpu.vector_store %arg3[%c0_3, %c0_4], %3 {strides = array<i32>} : memref<16x128xbf16, #tpu.memory_space<vmem>>, vector<16x128xbf16>,
    %cst_5 = arith.constant dense<0.000000e+00> : vector<128xf32>
    %5 = vector.multi_reduction <add>, %2, %cst_5 [0] : vector<16x128xf32> to vector<128xf32>
    %6 = vector.shape_cast %5 : vector<128xf32> to vector<1x128xf32>
    %c0_6 = arith.constant 0 : index
    %c0_7 = arith.constant 0 : index
    %c0_8 = arith.constant 0 : index
    %7 = vector.load %arg4[%c0_6, %c0_7, %c0_8] : memref<1x2x128xf32, #tpu.memory_space<vmem>>, vector<1x1x128xf32>
    %8 = vector.shape_cast %7 : vector<1x1x128xf32> to vector<1x128xf32>
    %9 = vector.shape_cast %6 : vector<1x128xf32> to vector<1x1x128xf32>
    tpu.vector_store %arg4[%c0_6, %c0_7, %c0_8], %9 {strides = array<i32>} : memref<1x2x128xf32, #tpu.memory_space<vmem>>, vector<1x1x128xf32>,
    %10 = arith.mulf %2, %2 : vector<16x128xf32>
    %cst_9 = arith.constant dense<0.000000e+00> : vector<128xf32>
    %11 = vector.multi_reduction <add>, %10, %cst_9 [0] : vector<16x128xf32> to vector<128xf32>
    %12 = vector.shape_cast %11 : vector<128xf32> to vector<1x128xf32>
    %c0_10 = arith.constant 0 : index
    %c1 = arith.constant 1 : index
    %c0_11 = arith.constant 0 : index
    %13 = vector.load %arg4[%c0_10, %c1, %c0_11] : memref<1x2x128xf32, #tpu.memory_space<vmem>>, vector<1x1x128xf32>
    %14 = vector.shape_cast %13 : vector<1x1x128xf32> to vector<1x128xf32>
    %15 = vector.shape_cast %12 : vector<1x128xf32> to vector<1x1x128xf32>
    tpu.vector_store %arg4[%c0_10, %c1, %c0_11], %15 {strides = array<i32>} : memref<1x2x128xf32, #tpu.memory_space<vmem>>, vector<1x1x128xf32>,
    return
  }
  func.func @transform_0(%arg0: i32) -> (i32, i32) {
    %c0_i32 = arith.constant 0 : i32
    %c0_i32_0 = arith.constant 0 : i32
    return %arg0, %c0_i32 : i32, i32
  }
  func.func @transform_1(%arg0: i32) -> (i32, i32) {
    %c0_i32 = arith.constant 0 : i32
    %c0_i32_0 = arith.constant 0 : i32
    %c0_i32_1 = arith.constant 0 : i32
    return %c0_i32, %c0_i32_0 : i32, i32
  }
  func.func @transform_2(%arg0: i32) -> (i32, i32) {
    %c0_i32 = arith.constant 0 : i32
    %c0_i32_0 = arith.constant 0 : i32
    return %arg0, %c0_i32 : i32, i32
  }
  func.func @transform_3(%arg0: i32) -> (i32, i32, i32) {
    %c0_i32 = arith.constant 0 : i32
    %c0_i32_0 = arith.constant 0 : i32
    %c0_i32_1 = arith.constant 0 : i32
    return %arg0, %c0_i32, %c0_i32_0 : i32, i32, i32
  }
}

module attributes {stable_mosaic.version = 11 : i64} {
  func.func @_head_kernel(%arg0: i32, %arg1: memref<2x128xbf16, #tpu.memory_space<vmem>>, %arg2: memref<1x128xf32, #tpu.memory_space<vmem>>, %arg3: memref<1x1xf32, #tpu.memory_space<vmem>>, %arg4: memref<2x1xf32, #tpu.memory_space<vmem>>) attributes {dimension_semantics = [#tpu.dimension_semantics<arbitrary>], iteration_bounds = array<i64: 1>, scalar_prefetch = 0 : i64, scratch_operands = 0 : i64, tpu.core_type = #tpu.core_type<tc>, window_params = [{pipeline_mode = #tpu.pipeline_mode<synchronous>, transform_indices = @transform_0, window_bounds = array<i64: 2, 128>}, {pipeline_mode = #tpu.pipeline_mode<synchronous>, transform_indices = @transform_1, window_bounds = array<i64: 1, 128>}, {pipeline_mode = #tpu.pipeline_mode<synchronous>, transform_indices = @transform_2, window_bounds = array<i64: 1, 1>}, {pipeline_mode = #tpu.pipeline_mode<synchronous>, transform_indices = @transform_3, window_bounds = array<i64: 2, 1>}]} {
    %c0 = arith.constant 0 : index
    %c0_0 = arith.constant 0 : index
    %0 = vector.load %arg1[%c0, %c0_0] : memref<2x128xbf16, #tpu.memory_space<vmem>>, vector<2x128xbf16>
    %1 = arith.extf %0 : vector<2x128xbf16> to vector<2x128xf32>
    %c0_1 = arith.constant 0 : index
    %c0_2 = arith.constant 0 : index
    %2 = vector.load %arg2[%c0_1, %c0_2] : memref<1x128xf32, #tpu.memory_space<vmem>>, vector<1x128xf32>
    %3 = vector.broadcast %2 : vector<1x128xf32> to vector<2x128xf32>
    %4 = arith.mulf %1, %3 : vector<2x128xf32>
    %cst = arith.constant dense<0.000000e+00> : vector<2xf32>
    %5 = vector.multi_reduction <add>, %4, %cst [1] : vector<2x128xf32> to vector<2xf32>
    %6 = vector.shape_cast %5 : vector<2xf32> to vector<2x1xf32>
    %c0_3 = arith.constant 0 : index
    %c0_4 = arith.constant 0 : index
    %7 = vector.load %arg3[%c0_3, %c0_4] : memref<1x1xf32, #tpu.memory_space<vmem>>, vector<1x1xf32>
    %8 = vector.broadcast %7 : vector<1x1xf32> to vector<2x1xf32>
    %9 = arith.addf %6, %8 : vector<2x1xf32>
    %10 = arith.negf %9 : vector<2x1xf32>
    %11 = math.exp %10 : vector<2x1xf32>
    %cst_5 = arith.constant 1.000000e+00 : f32
    %12 = vector.broadcast %cst_5 : f32 to vector<2x1xf32>
    %13 = arith.addf %12, %11 : vector<2x1xf32>
    %14 = arith.divf %12, %13 : vector<2x1xf32>
    %c0_6 = arith.constant 0 : index
    %c0_7 = arith.constant 0 : index
    %15 = vector.load %arg4[%c0_6, %c0_7] : memref<2x1xf32, #tpu.memory_space<vmem>>, vector<2x1xf32>
    tpu.vector_store %arg4[%c0_6, %c0_7], %14 {strides = array<i32>} : memref<2x1xf32, #tpu.memory_space<vmem>>, vector<2x1xf32>,
    return
  }
  func.func @transform_0(%arg0: i32) -> (i32, i32) {
    %c0_i32 = arith.constant 0 : i32
    %c0_i32_0 = arith.constant 0 : i32
    %c0_i32_1 = arith.constant 0 : i32
    return %c0_i32, %c0_i32_0 : i32, i32
  }
  func.func @transform_1(%arg0: i32) -> (i32, i32) {
    %c0_i32 = arith.constant 0 : i32
    %c0_i32_0 = arith.constant 0 : i32
    %c0_i32_1 = arith.constant 0 : i32
    return %c0_i32, %c0_i32_0 : i32, i32
  }
  func.func @transform_2(%arg0: i32) -> (i32, i32) {
    %c0_i32 = arith.constant 0 : i32
    %c0_i32_0 = arith.constant 0 : i32
    %c0_i32_1 = arith.constant 0 : i32
    return %c0_i32, %c0_i32_0 : i32, i32
  }
  func.func @transform_3(%arg0: i32) -> (i32, i32) {
    %c0_i32 = arith.constant 0 : i32
    %c0_i32_0 = arith.constant 0 : i32
    %c0_i32_1 = arith.constant 0 : i32
    return %c0_i32, %c0_i32_0 : i32, i32
  }
}

</mosaic_0001>

<bundles_post_ra>
// kernel: discriminator_forward.8
= control target key start
LH: loop header
LB: loop body
LE: loop exit
PB: predicated region body
PF: predicated region fallthrough
CT: control target
= control target key end

     0   :  { %s564_s12 = smov 0   ;;  %s602_s0 = inlined_call_operand.vmem [shape: bf16[128,48], index: 0, kind: input, shape index: {}]   ;;  %s603_s1 = inlined_call_operand.vmem [shape: bf16[48,128], index: 1, kind: input, shape index: {}]   ;;  %s604_s2 = inlined_call_operand.vmem [shape: f32[1,128], index: 2, kind: input, shape index: {}]   ;;  %s605_s3 = inlined_call_operand.vmem [shape: bf16[128,128], index: 3, kind: output, shape index: {}]  }
   0x1 LB: > { %s432_s13 = sadd.s32 4294967295, %s542_s12   ;;  %p436_p0 = scmp.ge.s32.totalorder %s542_s12, 1  ;;  %s542_s12 = sphi %s564_s12, %s13_s12  }
   0x2   : > { %p138_p1 = scmp.lt.s32.totalorder %s542_s12, 3 }
   0x4   : > { %p139_p2 = pnand %p436_p0, %p138_p1 }
   0x5   : > { %v529_v0 = vld [vmem:[%s603_s1] sm:$0xff] (!%p139_p2)   ;;  %s437_s16 = sshll.u32 (!%p139_p2), %s432_s13, 3  ;;  %v530_v1 = vld [vmem:[%s603_s1 + $0x8] sm:$0xff] (!%p139_p2)   ;;  %v531_v2 = vld [vmem:[%s603_s1 + $0x10] sm:$0xff] (!%p139_p2)   ;;  %vm234_vm0 = vcmask (!%p139_p2), 392192  }
   0x6   : > { %142 = sbr.rel (%p139_p2) target bundleno = 243 (0xf3), region = 32  ;;  %p163_p3 = scmp.lt.s32.totalorder (!%p139_p2), %s437_s16, 15  ;;  %501 = vmatprep.subr.bf16.mxu0 (!%p139_p2), %v529_v0  ;;  %515 = vmatprep.subr.bf16.mxu1 (!%p139_p2), %v529_v0  ;;  %v441_v7 = vld [vmem:[%s604_s2] ss:$0 sm:$0xff] (!%p139_p2) }
   0x7   : > { %502 = vmatpush3.bf16.msra.mxu0 (!%p139_p2), %v529_v0  ;;  %518 = vmatpush3.bf16.msra.mxu1 (!%p139_p2), %v529_v0 }
   0x8   : > { %503 = vmatprep.subr.bf16.mxu0 (!%p139_p2), %v530_v1  ;;  %516 = vmatprep.subr.bf16.mxu1 (!%p139_p2), %v530_v1 }
   0xb   : > { %504 = vmatpush3.bf16.msra.mxu0 (!%p139_p2), %v530_v1  ;;  %519 = vmatpush3.bf16.msra.mxu1 (!%p139_p2), %v530_v1 }
   0xc   : > { %505 = vmatprep.subr.bf16.mxu0 (!%p139_p2), %v531_v2  ;;  %517 = vmatprep.subr.bf16.mxu1 (!%p139_p2), %v531_v2 }
   0xd   : > { %s607_s16 = smov (!%p163_p3, %s437_s16), 15 }
   0xe   : > { %s438_s21 = sshll.u32 %s607_s16, 2 }
   0xf   : > { %s166_s24 = scalar_lea.vmem %s602_s0, %s438_s21  ;;  %506 = vmatpush3.bf16.msra.mxu0 %v531_v2  ;;  %520 = vmatpush3.bf16.msra.mxu1 %v531_v2  ;;  %s172_s29 = scalar_lea.vmem %s605_s3, %s438_s21 }
  0x10   : > { %v532_v3 = vld [vmem:[%s166_s24] sm:$0xff]   ;;  %v533_v4 = vld [vmem:[%s166_s24 + $0x10] sm:$0xff]   ;;  %v534_v5 = vld [vmem:[%s166_s24 + $0x8] sm:$0xff]  }
  0x11   : > { %507 = vmatprep.mubr.msk.bf16.mxu0 %vm234_vm0, %v532_v3  ;;  %511 = vmatprep.mubr.msk.bf16.mxu1 %vm234_vm0, %v533_v4  ;;  %v535_v6 = vld [vmem:[%s166_s24 + $0x18] sm:$0xff]  }
  0x12   : > { %508 = vmatmul.mubr.msk.bf16.vlgmr.msra.gmra.mrb[0].mxu0 %vm234_vm0, %v534_v5  ;;  %512 = vmatmul.mubr.msk.bf16.vlgmr.msra.gmra.mrb[0].mxu1 %vm234_vm0, %v535_v6 }
  0xe5   : > { %v509_v8 = vpop.f32.mrb[0].mxu0  ;;  %v513_v9 = vpop.f32.mrb[0].mxu1 }
  0xe6   : > { %v290_v10 = vadd.f32 %v509_v8, %v441_v7  ;;  %v306_v11 = vadd.f32 %v513_v9, %v441_v7  ;;  %v281_v12 = vpop.f32.mrb[1].mxu0  ;;  %v297_v13 = vpop.f32.mrb[1].mxu1 }
  0xe7   : > { %v282_v14 = vadd.f32 %v441_v7, %v281_v12  ;;  %v298_v15 = vadd.f32 %v441_v7, %v297_v13  ;;  %v510_v16 = vpop.f32.mrb[2].mxu0  ;;  %v514_v17 = vpop.f32.mrb[2].mxu1 }
  0xe8   : > { %vm314_vm1 = vcmp.ge.f32.partialorder %v290_v10, 0.0  ;;  %v322_v18 = vmul.f32 0.2, %v290_v10  ;;  %vm318_vm2 = vcmp.ge.f32.partialorder %v306_v11, 0.0  ;;  %v326_v19 = vmul.f32 0.2, %v306_v11 }
  0xe9   : > { %vm312_vm3 = vcmp.ge.f32.partialorder %v282_v14, 0.0  ;;  %v320_v20 = vmul.f32 0.2, %v282_v14  ;;  %vm316_vm4 = vcmp.ge.f32.partialorder %v298_v15, 0.0  ;;  %v324_v21 = vmul.f32 0.2, %v298_v15 }
  0xea   : > { %v293_v22 = vadd.f32 %v510_v16, %v441_v7  ;;  %v309_v23 = vadd.f32 %v514_v17, %v441_v7  ;;  %v284_v24 = vpop.f32.mrb[3].mxu0  ;;  %v300_v25 = vpop.f32.mrb[3].mxu1  ;;  %v330_v26 = vsel %vm314_vm1, %v290_v10, %v322_v18  ;;  %v334_v27 = vsel %vm318_vm2, %v306_v11, %v326_v19 }
  0xeb   : > { %v285_v28 = vadd.f32 %v441_v7, %v284_v24  ;;  %v301_v29 = vadd.f32 %v441_v7, %v300_v25  ;;  %v328_v34 = vsel %vm312_vm3, %v282_v14, %v320_v20  ;;  %v332_v35 = vsel %vm316_vm4, %v298_v15, %v324_v21 }
  0xec   : > { %vm315_vm5 = vcmp.ge.f32.partialorder %v293_v22, 0.0  ;;  %v323_v30 = vmul.f32 0.2, %v293_v22  ;;  %vm319_vm6 = vcmp.ge.f32.partialorder %v309_v23, 0.0  ;;  %v327_v31 = vmul.f32 0.2, %v309_v23 }
  0xed   : > { %vm313_vm7 = vcmp.ge.f32.partialorder %v285_v28, 0.0  ;;  %v321_v32 = vmul.f32 0.2, %v285_v28  ;;  %vm317_vm8 = vcmp.ge.f32.partialorder %v301_v29, 0.0  ;;  %v325_v33 = vmul.f32 0.2, %v301_v29 }
  0xee   : > { %v331_v36 = vsel %vm315_vm5, %v293_v22, %v323_v30  ;;  %v335_v37 = vsel %vm319_vm6, %v309_v23, %v327_v31 }
  0xef   : > { %v479_v38 = vpack.c.bf16 %v331_v36, %v330_v26  ;;  %v489_v39 = vpack.c.bf16 %v335_v37, %v334_v27  ;;  %v329_v40 = vsel %vm313_vm7, %v285_v28, %v321_v32  ;;  %v333_v41 = vsel %vm317_vm8, %v301_v29, %v325_v33 }
  0xf0   : > { %v474_v42 = vpack.c.bf16 %v329_v40, %v328_v34  ;;  %v484_v43 = vpack.c.bf16 %v333_v41, %v332_v35 }
  0xf1   : > { %491 = vst [vmem:[%s172_s29 + $0x8] sm:$0xff] %v479_v38   ;;  %493 = vst [vmem:[%s172_s29 + $0x18] sm:$0xff] %v489_v39  }
  0xf2   : > { %475 = vst [vmem:[%s172_s29] sm:$0xff] %v474_v42   ;;  %492 = vst [vmem:[%s172_s29 + $0x10] sm:$0xff] %v484_v43  }
  0xf3 PF: > { %s13_s12 = sadd.s32 1, %s542_s12  }
  0xf4   : > { %p10_p4 = scmp.ge.s32.totalorder %s13_s12, 4  }
  0xf6   :  { %12 = sbr.rel (!%p10_p4) target bundleno = 1 (0x1), region = 62 }

// kernel: discriminator_forward.10
= control target key start
LH: loop header
LB: loop body
LE: loop exit
PB: predicated region body
PF: predicated region fallthrough
CT: control target
= control target key end

     0   :  { %s330_s12 = smov 0   ;;  %s353_s0 = inlined_call_operand.vmem [shape: bf16[32,128], index: 0, kind: input, shape index: {}]   ;;  %s354_s1 = inlined_call_operand.vmem [shape: f32[1,128], index: 1, kind: input, shape index: {}]   ;;  %s355_s2 = inlined_call_operand.vmem [shape: f32[1,128], index: 2, kind: input, shape index: {}]   ;;  %s356_s3 = inlined_call_operand.vmem [shape: bf16[32,128], index: 3, kind: output, shape index: {}]  }
   0x1 LB: > { %s268_s13 = sadd.s32 4294967295, %s308_s12   ;;  %p272_p0 = scmp.ge.s32.totalorder %s308_s12, 1  ;;  %s308_s12 = sphi %s330_s12, %s13_s12  }
   0x2   : > { %p138_p1 = scmp.lt.s32.totalorder %s308_s12, 3 }
   0x4   : > { %p139_p2 = pnand %p272_p0, %p138_p1 }
   0x5   : > { %s273_s14 = sshll.u32 (!%p139_p2), %s268_s13, 1  ;;  %v277_v1 = vld [vmem:[%s354_s1] ss:$0 sm:$0xff] (!%p139_p2) }
   0x6   : > { %142 = sbr.rel (%p139_p2) target bundleno = 29 (0x1d), region = 32  ;;  %p163_p3 = scmp.lt.s32.totalorder (!%p139_p2), %s273_s14, 3  ;;  %v278_v4 = vld [vmem:[%s355_s2] ss:$0 sm:$0xff] (!%p139_p2) }
   0xd   : > { %s358_s14 = smov (!%p163_p3, %s273_s14), 3 }
   0xe   : > { %s274_s15 = sshll.u32 %s358_s14, 2 }
   0xf   : > { %s166_s18 = scalar_lea.vmem %s353_s0, %s274_s15  ;;  %s172_s25 = scalar_lea.vmem %s356_s3, %s274_s15 }
  0x10   : > { %v286_v0 = vld [vmem:[%s166_s18] sm:$0xff]  }
  0x11   : > { %v287_v2 = vunpack.c.l.bf16 %v286_v0  ;;  %v288_v3 = vunpack.c.h.bf16 %v286_v0 }
  0x13   : > { %v185_v5 = vmul.f32 %v287_v2, %v277_v1  ;;  %v186_v6 = vmul.f32 %v288_v3, %v277_v1 }
  0x15   : > { %v194_v7 = vadd.f32 %v278_v4, %v185_v5  ;;  %v195_v8 = vadd.f32 %v278_v4, %v186_v6 }
  0x17   : > { %vm196_vm0 = vcmp.ge.f32.partialorder %v194_v7, 0.0  ;;  %vm197_vm1 = vcmp.ge.f32.partialorder %v195_v8, 0.0  ;;  %v198_v9 = vmul.f32 0.2, %v194_v7  ;;  %v199_v10 = vmul.f32 0.2, %v195_v8 }
  0x19   : > { %v200_v11 = vsel %vm196_vm0, %v194_v7, %v198_v9  ;;  %v201_v12 = vsel %vm197_vm1, %v195_v8, %v199_v10 }
  0x1a   : > { %v292_v13 = vpack.c.bf16 %v201_v12, %v200_v11 }
  0x1c   : > { %293 = vst [vmem:[%s172_s25] sm:$0xff] %v292_v13  }
  0x1d PF: > { %s13_s12 = sadd.s32 1, %s308_s12  }
  0x1e   : > { %p10_p4 = scmp.ge.s32.totalorder %s13_s12, 4  }
  0x20   :  { %12 = sbr.rel (!%p10_p4) target bundleno = 1 (0x1), region = 62 }

// kernel: discriminator_forward.9
= control target key start
LH: loop header
LB: loop body
LE: loop exit
PB: predicated region body
PF: predicated region fallthrough
CT: control target
= control target key end

     0   :  { %s2259_s12 = smov 0   ;;  %s2690_s0 = inlined_call_operand.vmem [shape: bf16[32,2048], index: 0, kind: input, shape index: {}]   ;;  %s2691_s1 = inlined_call_operand.vmem [shape: bf16[2048,128], index: 1, kind: input, shape index: {}]   ;;  %s2692_s2 = inlined_call_operand.vmem [shape: bf16[32,128], index: 2, kind: output, shape index: {0}]   ;;  %s2693_s3 = inlined_call_operand.vmem [shape: f32[2,2,128], index: 3, kind: output, shape index: {1}]  }
   0x1 LB: > { %s2265_s13 = sadd.s32 4294967295, %s2237_s12   ;;  %p1756_p0 = scmp.ge.s32.totalorder %s2237_s12, 1  ;;  %s2237_s12 = sphi %s2259_s12, %s14_s12  }
   0x2   : > { %p142_p1 = scmp.lt.s32.totalorder %s2237_s12, 3 }
   0x4   : > { %p143_p2 = pnand %p1756_p0, %p142_p1 }
   0x5   : > { %v2103_v0 = vld [vmem:[%s2691_s1 + $0x40] sm:$0xff] (!%p143_p2)   ;;  %v2107_v4 = vld [vmem:[%s2691_s1 + $0x48] sm:$0xff] (!%p143_p2)   ;;  %v2111_v8 = vld [vmem:[%s2691_s1 + $0x50] sm:$0xff] (!%p143_p2)   ;;  %s1757_s21 = sshll.u32 (!%p143_p2), %s2265_s13, 1  ;;  %p184_p4 = scmp.lt.s32.totalorder (!%p143_p2), %s2265_s13, 1 }
   0x6   : > { %146 = sbr.rel (%p143_p2) target bundleno = 373 (0x175), region = 28  ;;  %v2104_v1 = vld [vmem:[%s2691_s1 + $0xc0] sm:$0xff] (!%p143_p2)   ;;  %1919 = vmatprep.subr.bf16.mxu0 (!%p143_p2), %v2103_v0  ;;  %v2108_v5 = vld [vmem:[%s2691_s1 + $0xc8] sm:$0xff] (!%p143_p2)   ;;  %v2112_v9 = vld [vmem:[%s2691_s1 + $0xd0] sm:$0xff] (!%p143_p2)   ;;  %p172_p3 = scmp.lt.s32.totalorder (!%p143_p2), %s1757_s21, 3 }
   0x7   : > { %v2105_v2 = vld [vmem:[%s2691_s1] sm:$0xff] (!%p143_p2)   ;;  %1941 = vmatprep.subr.bf16.mxu1 (!%p143_p2), %v2104_v1  ;;  %v2109_v6 = vld [vmem:[%s2691_s1 + $0x8] sm:$0xff] (!%p143_p2)   ;;  %v2113_v10 = vld [vmem:[%s2691_s1 + $0x10] sm:$0xff] (!%p143_p2)  }
   0x8   : > { %v2106_v3 = vld [vmem:[%s2691_s1 + $0x80] sm:$0xff] (!%p143_p2)   ;;  %1920 = vmatpush3.bf16.msra.mxu0 (!%p143_p2), %v2105_v2  ;;  %v2110_v7 = vld [vmem:[%s2691_s1 + $0x88] sm:$0xff] (!%p143_p2)   ;;  %v2114_v11 = vld [vmem:[%s2691_s1 + $0x90] sm:$0xff] (!%p143_p2)  }
   0x9   : > { %1942 = vmatpush3.bf16.msra.mxu1 (!%p143_p2), %v2106_v3  ;;  %1921 = vmatprep.subr.bf16.mxu0 (!%p143_p2), %v2107_v4  ;;  %v2115_v12 = vld [vmem:[%s2691_s1 + $0x58] sm:$0xff] (!%p143_p2)   ;;  %v2119_v16 = vld [vmem:[%s2691_s1 + $0x60] sm:$0xff] (!%p143_p2)   ;;  %v2123_v20 = vld [vmem:[%s2691_s1 + $0x68] sm:$0xff] (!%p143_p2)  }
   0xa   : > { %1943 = vmatprep.subr.bf16.mxu1 (!%p143_p2), %v2108_v5  ;;  %v2116_v13 = vld [vmem:[%s2691_s1 + $0xd8] sm:$0xff] (!%p143_p2)   ;;  %v2120_v17 = vld [vmem:[%s2691_s1 + $0xe0] sm:$0xff] (!%p143_p2)   ;;  %v2124_v21 = vld [vmem:[%s2691_s1 + $0xe8] sm:$0xff] (!%p143_p2)  }
   0xb   : > { %v2117_v14 = vld [vmem:[%s2691_s1 + $0x18] sm:$0xff] (!%p143_p2)   ;;  %v2121_v18 = vld [vmem:[%s2691_s1 + $0x20] sm:$0xff] (!%p143_p2)   ;;  %v2125_v22 = vld [vmem:[%s2691_s1 + $0x28] sm:$0xff] (!%p143_p2)  }
   0xc   : > { %1922 = vmatpush3.bf16.msra.mxu0 (!%p143_p2), %v2109_v6  ;;  %v2118_v15 = vld [vmem:[%s2691_s1 + $0x98] sm:$0xff] (!%p143_p2)   ;;  %v2122_v19 = vld [vmem:[%s2691_s1 + $0xa0] sm:$0xff] (!%p143_p2)   ;;  %v2126_v23 = vld [vmem:[%s2691_s1 + $0xa8] sm:$0xff] (!%p143_p2)  }
   0xd   : > { %1944 = vmatpush3.bf16.msra.mxu1 %v2110_v7  ;;  %1923 = vmatprep.subr.bf16.mxu0 %v2111_v8  ;;  %s2695_s21 = smov (!%p172_p3, %s1757_s21), 3  ;;  %v2127_v24 = vld [vmem:[%s2691_s1 + $0x70] sm:$0xff]   ;;  %v2131_v28 = vld [vmem:[%s2691_s1 + $0x78] sm:$0xff]   ;;  %v2135_v40 = vld [vmem:[%s2691_s1 + $0x140] sm:$0xff]   ;;  %s2697_s13 = smov (!%p184_p4, %s2265_s13), 1 }
   0xe   : > { %1945 = vmatprep.subr.bf16.mxu1 %v2112_v9  ;;  %v2128_v25 = vld [vmem:[%s2691_s1 + $0xf0] sm:$0xff]   ;;  %s1911_s19 = sshll.u32 %s2695_s21, 6  ;;  %v2132_v29 = vld [vmem:[%s2691_s1 + $0xf8] sm:$0xff]   ;;  %v2136_v41 = vld [vmem:[%s2691_s1 + $0x1c0] sm:$0xff]   ;;  %s1762_s20 = sshll.u32 %s2697_s13, 1 }
   0xf   : > { %v2129_v26 = vld [vmem:[%s2691_s1 + $0x30] sm:$0xff]   ;;  %s2366_s29 = scalar_lea.vmem %s2690_s0, %s1911_s19  ;;  %v2133_v30 = vld [vmem:[%s2691_s1 + $0x38] sm:$0xff]   ;;  %v2137_v42 = vld [vmem:[%s2691_s1 + $0x100] sm:$0xff]   ;;  %s187_s23 = scalar_lea.vmem %s2693_s3, %s1762_s20 }
  0x10   : > { %1924 = vmatpush3.bf16.msra.mxu0 %v2113_v10  ;;  %v2130_v27 = vld [vmem:[%s2691_s1 + $0xb0] sm:$0xff]   ;;  %v2134_v31 = vld [vmem:[%s2691_s1 + $0xb8] sm:$0xff]   ;;  %v189_v32 = vld [vmem:[%s2366_s29] sm:$0xff] }
  0x11   : > { %1946 = vmatpush3.bf16.msra.mxu1 %v2114_v11  ;;  %1925 = vmatprep.subr.bf16.mxu0 %v2115_v12  ;;  %v197_v33 = vld [vmem:[%s2366_s29 + $0x40] sm:$0xff]  ;;  %v190_v34 = vld [vmem:[%s2366_s29 + $0x8] sm:$0xff]  ;;  %v2143_v48 = vld [vmem:[%s2691_s1 + $0x150] sm:$0xff]  }
  0x12   : > { %1947 = vmatprep.subr.bf16.mxu1 %v2116_v13  ;;  %v1763_v35 = vcombine.low %v189_v32, %v197_v33  ;;  %v1764_v36 = vcombine.high %v189_v32, %v197_v33  ;;  %v198_v37 = vld [vmem:[%s2366_s29 + $0x48] sm:$0xff]  ;;  %v2138_v43 = vld [vmem:[%s2691_s1 + $0x180] sm:$0xff]   ;;  %v2144_v49 = vld [vmem:[%s2691_s1 + $0x1d0] sm:$0xff]  }
  0x13   : > { %v1765_v38 = vcombine.low %v190_v34, %v198_v37  ;;  %v1766_v39 = vcombine.high %v190_v34, %v198_v37  ;;  %v2139_v44 = vld [vmem:[%s2691_s1 + $0x148] sm:$0xff]   ;;  %v2145_v50 = vld [vmem:[%s2691_s1 + $0x110] sm:$0xff]   ;;  %v2147_v52 = vld [vmem:[%s2691_s1 + $0x158] sm:$0xff]  }
  0x14   : > { %1926 = vmatpush3.bf16.msra.mxu0 %v2117_v14  ;;  %1341 = vmatprep.mubr.bf16.mxu0 %v1764_v36  ;;  %v2140_v45 = vld [vmem:[%s2691_s1 + $0x1c8] sm:$0xff]   ;;  %v2146_v51 = vld [vmem:[%s2691_s1 + $0x190] sm:$0xff]   ;;  %v2148_v53 = vld [vmem:[%s2691_s1 + $0x1d8] sm:$0xff]  }
  0x15   : > { %1948 = vmatpush3.bf16.msra.mxu1 %v2118_v15  ;;  %1927 = vmatprep.subr.bf16.mxu0 %v2119_v16  ;;  %v2141_v46 = vld [vmem:[%s2691_s1 + $0x108] sm:$0xff]   ;;  %v2149_v54 = vld [vmem:[%s2691_s1 + $0x118] sm:$0xff]   ;;  %v2151_v56 = vld [vmem:[%s2691_s1 + $0x160] sm:$0xff]  }
  0x16   : > { %1949 = vmatprep.subr.bf16.mxu1 %v2120_v17  ;;  %1382 = vmatprep.mubr.bf16.mxu1 %v1766_v39  ;;  %v2142_v47 = vld [vmem:[%s2691_s1 + $0x188] sm:$0xff]   ;;  %v2150_v55 = vld [vmem:[%s2691_s1 + $0x198] sm:$0xff]   ;;  %v2152_v57 = vld [vmem:[%s2691_s1 + $0x1e0] sm:$0xff]  }
  0x17   : > { %v2153_v58 = vld [vmem:[%s2691_s1 + $0x120] sm:$0xff]   ;;  %v2155_v60 = vld [vmem:[%s2691_s1 + $0x168] sm:$0xff]   ;;  %v2159_v0 = vld [vmem:[%s2691_s1 + $0x170] sm:$0xff]  }
  0x18   : > { %1928 = vmatpush3.bf16.msra.mxu0 %v2121_v18  ;;  %v2154_v59 = vld [vmem:[%s2691_s1 + $0x1a0] sm:$0xff]   ;;  %v2156_v61 = vld [vmem:[%s2691_s1 + $0x1e8] sm:$0xff]   ;;  %v2160_v1 = vld [vmem:[%s2691_s1 + $0x1f0] sm:$0xff]  }
  0x19   : > { %1950 = vmatpush3.bf16.msra.mxu1 %v2122_v19  ;;  %1929 = vmatprep.subr.bf16.mxu0 %v2123_v20  ;;  %v2157_v62 = vld [vmem:[%s2691_s1 + $0x128] sm:$0xff]   ;;  %v2161_v2 = vld [vmem:[%s2691_s1 + $0x130] sm:$0xff]   ;;  %v2163_v4 = vld [vmem:[%s2691_s1 + $0x178] sm:$0xff]  }
  0x1a   : > { %1951 = vmatprep.subr.bf16.mxu1 %v2124_v21  ;;  %v2158_v63 = vld [vmem:[%s2691_s1 + $0x1a8] sm:$0xff]   ;;  %v2162_v3 = vld [vmem:[%s2691_s1 + $0x1b0] sm:$0xff]   ;;  %v2164_v5 = vld [vmem:[%s2691_s1 + $0x1f8] sm:$0xff]  }
  0x1b   : > { %v2165_v6 = vld [vmem:[%s2691_s1 + $0x138] sm:$0xff]   ;;  %v191_v8 = vld [vmem:[%s2366_s29 + $0x10] sm:$0xff]  ;;  %v2167_v16 = vld [vmem:[%s2691_s1 + $0x240] sm:$0xff]  }
  0x1c   : > { %1930 = vmatpush3.bf16.msra.mxu0 %v2125_v22  ;;  %v2166_v7 = vld [vmem:[%s2691_s1 + $0x1b8] sm:$0xff]   ;;  %v199_v9 = vld [vmem:[%s2366_s29 + $0x50] sm:$0xff]  ;;  %v2168_v17 = vld [vmem:[%s2691_s1 + $0x2c0] sm:$0xff]  }
  0x1d   : > { %1952 = vmatpush3.bf16.msra.mxu1 %v2126_v23  ;;  %1931 = vmatprep.subr.bf16.mxu0 %v2127_v24  ;;  %v1767_v10 = vcombine.low %v191_v8, %v199_v9  ;;  %v1768_v11 = vcombine.high %v191_v8, %v199_v9  ;;  %v192_v12 = vld [vmem:[%s2366_s29 + $0x18] sm:$0xff]  ;;  %v2169_v18 = vld [vmem:[%s2691_s1 + $0x200] sm:$0xff]   ;;  %v2171_v20 = vld [vmem:[%s2691_s1 + $0x248] sm:$0xff]  }
  0x1e   : > { %1953 = vmatprep.subr.bf16.mxu1 %v2128_v25  ;;  %v200_v13 = vld [vmem:[%s2366_s29 + $0x58] sm:$0xff]  ;;  %v2170_v19 = vld [vmem:[%s2691_s1 + $0x280] sm:$0xff]   ;;  %v2172_v21 = vld [vmem:[%s2691_s1 + $0x2c8] sm:$0xff]  }
  0x1f   : > { %v1769_v14 = vcombine.low %v192_v12, %v200_v13  ;;  %v1770_v15 = vcombine.high %v192_v12, %v200_v13  ;;  %v2173_v22 = vld [vmem:[%s2691_s1 + $0x208] sm:$0xff]   ;;  %v2175_v24 = vld [vmem:[%s2691_s1 + $0x250] sm:$0xff]   ;;  %v2183_v32 = vld [vmem:[%s2691_s1 + $0x260] sm:$0xff]  }
  0x20   : > { %1932 = vmatpush3.bf16.msra.mxu0 %v2129_v26  ;;  %v2174_v23 = vld [vmem:[%s2691_s1 + $0x288] sm:$0xff]   ;;  %v2176_v25 = vld [vmem:[%s2691_s1 + $0x2d0] sm:$0xff]   ;;  %v2184_v33 = vld [vmem:[%s2691_s1 + $0x2e0] sm:$0xff]  }
  0x21   : > { %1954 = vmatpush3.bf16.msra.mxu1 %v2130_v27  ;;  %1933 = vmatprep.subr.bf16.mxu0 %v2131_v28  ;;  %v2177_v26 = vld [vmem:[%s2691_s1 + $0x210] sm:$0xff]   ;;  %v2179_v28 = vld [vmem:[%s2691_s1 + $0x258] sm:$0xff]   ;;  %v2185_v34 = vld [vmem:[%s2691_s1 + $0x220] sm:$0xff]  }
  0x22   : > { %1955 = vmatprep.subr.bf16.mxu1 %v2132_v29  ;;  %v2178_v27 = vld [vmem:[%s2691_s1 + $0x290] sm:$0xff]   ;;  %v2180_v29 = vld [vmem:[%s2691_s1 + $0x2d8] sm:$0xff]   ;;  %v2187_v36 = vld [vmem:[%s2691_s1 + $0x268] sm:$0xff]  }
  0x23   : > { %v2188_v37 = vld [vmem:[%s2691_s1 + $0x2e8] sm:$0xff]   ;;  %v2215_v8 = vld [vmem:[%s2691_s1 + $0x360] sm:$0xff]  }
  0x24   : > { %1934 = vmatpush3.bf16.msra.mxu0 %v2133_v30  ;;  %v2181_v30 = vld [vmem:[%s2691_s1 + $0x218] sm:$0xff]   ;;  %v2190_v39 = vld [vmem:[%s2691_s1 + $0x2a8] sm:$0xff]   ;;  %v2216_v9 = vld [vmem:[%s2691_s1 + $0x3e0] sm:$0xff]  }
  0x25   : > { %1956 = vmatpush3.bf16.msra.mxu1 %v2134_v31  ;;  %1963 = vmatprep.subr.bf16.mxu0 %v2135_v40  ;;  %v2182_v31 = vld [vmem:[%s2691_s1 + $0x298] sm:$0xff]   ;;  %v2191_v40 = vld [vmem:[%s2691_s1 + $0x270] sm:$0xff]   ;;  %v2219_v12 = vld [vmem:[%s2691_s1 + $0x368] sm:$0xff]  }
  0x26   : > { %1985 = vmatprep.subr.bf16.mxu1 %v2136_v41  ;;  %v2192_v41 = vld [vmem:[%s2691_s1 + $0x2f0] sm:$0xff]   ;;  %v2220_v13 = vld [vmem:[%s2691_s1 + $0x3e8] sm:$0xff]  }
  0x27   : > { %1342 = vmatmul.mubr.bf16.vlgmr.msra.gmra.mrb[0].mxu0 %v1763_v35  ;;  %v2186_v35 = vld [vmem:[%s2691_s1 + $0x2a0] sm:$0xff]  }
  0x28   : > { %1383 = vmatmul.mubr.bf16.vlgmr.msra.gmra.mrb[0].mxu1 %v1765_v38  ;;  %1964 = vmatpush3.bf16.msra.mxu0 %v2137_v42  ;;  %v2189_v38 = vld [vmem:[%s2691_s1 + $0x228] sm:$0xff]   ;;  %v2193_v42 = vld [vmem:[%s2691_s1 + $0x230] sm:$0xff]  }
  0x29   : > { %1986 = vmatpush3.bf16.msra.mxu1 %v2138_v43  ;;  %1965 = vmatprep.subr.bf16.mxu0 %v2139_v44  ;;  %v2194_v43 = vld [vmem:[%s2691_s1 + $0x2b0] sm:$0xff]   ;;  %v2195_v44 = vld [vmem:[%s2691_s1 + $0x278] sm:$0xff]  }
  0x2a   : > { %1987 = vmatprep.subr.bf16.mxu1 %v2140_v45  ;;  %1423 = vmatprep.mubr.bf16.mxu0 %v1768_v11  ;;  %v2196_v45 = vld [vmem:[%s2691_s1 + $0x2f8] sm:$0xff]   ;;  %v2218_v11 = vld [vmem:[%s2691_s1 + $0x3a0] sm:$0xff]  }
  0x2b   : > { %1464 = vmatprep.mubr.bf16.mxu1 %v1770_v15  ;;  %v2222_v15 = vld [vmem:[%s2691_s1 + $0x3a8] sm:$0xff]  }
  0x2c   : > { %1966 = vmatpush3.bf16.msra.mxu0 %v2141_v46  ;;  %v2197_v46 = vld [vmem:[%s2691_s1 + $0x238] sm:$0xff]  }
  0x2d   : > { %1988 = vmatpush3.bf16.msra.mxu1 %v2142_v47  ;;  %1967 = vmatprep.subr.bf16.mxu0 %v2143_v48  ;;  %v2198_v47 = vld [vmem:[%s2691_s1 + $0x2b8] sm:$0xff]   ;;  %v193_v48 = vld [vmem:[%s2366_s29 + $0x20] sm:$0xff] }
  0x2e   : > { %1989 = vmatprep.subr.bf16.mxu1 %v2144_v49  ;;  %v201_v49 = vld [vmem:[%s2366_s29 + $0x60] sm:$0xff] }
  0x30   : > { %1968 = vmatpush3.bf16.msra.mxu0 %v2145_v50  ;;  %v194_v50 = vld [vmem:[%s2366_s29 + $0x28] sm:$0xff] }
  0x31   : > { %1990 = vmatpush3.bf16.msra.mxu1 %v2146_v51  ;;  %1969 = vmatprep.subr.bf16.mxu0 %v2147_v52  ;;  %v202_v51 = vld [vmem:[%s2366_s29 + $0x68] sm:$0xff]  ;;  %v1771_v52 = vcombine.low %v193_v48, %v201_v49 }
  0x32   : > { %1991 = vmatprep.subr.bf16.mxu1 %v2148_v53  ;;  %v1772_v53 = vcombine.high %v193_v48, %v201_v49 }
  0x34   : > { %1970 = vmatpush3.bf16.msra.mxu0 %v2149_v54  ;;  %v1773_v54 = vcombine.low %v194_v50, %v202_v51 }
  0x35   : > { %1992 = vmatpush3.bf16.msra.mxu1 %v2150_v55  ;;  %1971 = vmatprep.subr.bf16.mxu0 %v2151_v56  ;;  %v1774_v55 = vcombine.high %v194_v50, %v202_v51  ;;  %v2199_v56 = vld [vmem:[%s2691_s1 + $0x340] sm:$0xff]  }
  0x36   : > { %1993 = vmatprep.subr.bf16.mxu1 %v2152_v57  ;;  %v2200_v57 = vld [vmem:[%s2691_s1 + $0x3c0] sm:$0xff]  }
  0x38   : > { %1972 = vmatpush3.bf16.msra.mxu0 %v2153_v58  ;;  %v2201_v58 = vld [vmem:[%s2691_s1 + $0x300] sm:$0xff]  }
  0x39   : > { %1994 = vmatpush3.bf16.msra.mxu1 %v2154_v59  ;;  %1973 = vmatprep.subr.bf16.mxu0 %v2155_v60  ;;  %v2202_v59 = vld [vmem:[%s2691_s1 + $0x380] sm:$0xff]   ;;  %v2203_v60 = vld [vmem:[%s2691_s1 + $0x348] sm:$0xff]  }
  0x3a   : > { %1995 = vmatprep.subr.bf16.mxu1 %v2156_v61  ;;  %v2204_v61 = vld [vmem:[%s2691_s1 + $0x3c8] sm:$0xff]  }
  0x3c   : > { %1974 = vmatpush3.bf16.msra.mxu0 %v2157_v62  ;;  %v2205_v62 = vld [vmem:[%s2691_s1 + $0x308] sm:$0xff]  }
  0x3d   : > { %1996 = vmatpush3.bf16.msra.mxu1 %v2158_v63  ;;  %1975 = vmatprep.subr.bf16.mxu0 %v2159_v0  ;;  %v2206_v63 = vld [vmem:[%s2691_s1 + $0x388] sm:$0xff]   ;;  %v2207_v0 = vld [vmem:[%s2691_s1 + $0x350] sm:$0xff]  }
  0x3e   : > { %1997 = vmatprep.subr.bf16.mxu1 %v2160_v1  ;;  %v2208_v1 = vld [vmem:[%s2691_s1 + $0x3d0] sm:$0xff]  }
  0x40   : > { %1976 = vmatpush3.bf16.msra.mxu0 %v2161_v2  ;;  %v2209_v2 = vld [vmem:[%s2691_s1 + $0x310] sm:$0xff]  }
  0x41   : > { %1998 = vmatpush3.bf16.msra.mxu1 %v2162_v3  ;;  %1977 = vmatprep.subr.bf16.mxu0 %v2163_v4  ;;  %v2210_v3 = vld [vmem:[%s2691_s1 + $0x390] sm:$0xff]   ;;  %v2211_v4 = vld [vmem:[%s2691_s1 + $0x358] sm:$0xff]  }
  0x42   : > { %1999 = vmatprep.subr.bf16.mxu1 %v2164_v5  ;;  %v2212_v5 = vld [vmem:[%s2691_s1 + $0x3d8] sm:$0xff]  }
  0x44   : > { %1978 = vmatpush3.bf16.msra.mxu0 %v2165_v6  ;;  %v2213_v6 = vld [vmem:[%s2691_s1 + $0x318] sm:$0xff]  }
  0x45   : > { %2000 = vmatpush3.bf16.msra.mxu1 %v2166_v7  ;;  %2007 = vmatprep.subr.bf16.mxu0 %v2167_v16  ;;  %v2214_v7 = vld [vmem:[%s2691_s1 + $0x398] sm:$0xff]   ;;  %v2223_v16 = vld [vmem:[%s2691_s1 + $0x370] sm:$0xff]  }
  0x46   : > { %2029 = vmatprep.subr.bf16.mxu1 %v2168_v17  ;;  %v2224_v17 = vld [vmem:[%s2691_s1 + $0x3f0] sm:$0xff]  }
  0x47   : > { %1424 = vmatmul.mubr.bf16.vlgmr.msra.gmra.mrb[4].mxu0 %v1767_v10  ;;  %v2217_v10 = vld [vmem:[%s2691_s1 + $0x320] sm:$0xff]  }
  0x48   : > { %1465 = vmatmul.mubr.bf16.vlgmr.msra.gmra.mrb[4].mxu1 %v1769_v14  ;;  %2008 = vmatpush3.bf16.msra.mxu0 %v2169_v18  ;;  %v2221_v14 = vld [vmem:[%s2691_s1 + $0x328] sm:$0xff]   ;;  %v2225_v18 = vld [vmem:[%s2691_s1 + $0x330] sm:$0xff]  }
  0x49   : > { %2030 = vmatpush3.bf16.msra.mxu1 %v2170_v19  ;;  %2009 = vmatprep.subr.bf16.mxu0 %v2171_v20  ;;  %v2226_v19 = vld [vmem:[%s2691_s1 + $0x3b0] sm:$0xff]   ;;  %v2227_v20 = vld [vmem:[%s2691_s1 + $0x378] sm:$0xff]  }
  0x4a   : > { %2031 = vmatprep.subr.bf16.mxu1 %v2172_v21  ;;  %1505 = vmatprep.mubr.bf16.mxu0 %v1772_v53  ;;  %v2228_v21 = vld [vmem:[%s2691_s1 + $0x3f8] sm:$0xff]  }
  0x4b   : > { %1546 = vmatprep.mubr.bf16.mxu1 %v1774_v55 }
  0x4c   : > { %2010 = vmatpush3.bf16.msra.mxu0 %v2173_v22  ;;  %v2229_v22 = vld [vmem:[%s2691_s1 + $0x338] sm:$0xff]  }
  0x4d   : > { %2032 = vmatpush3.bf16.msra.mxu1 %v2174_v23  ;;  %2011 = vmatprep.subr.bf16.mxu0 %v2175_v24  ;;  %v2230_v23 = vld [vmem:[%s2691_s1 + $0x3b8] sm:$0xff]   ;;  %v195_v24 = vld [vmem:[%s2366_s29 + $0x30] sm:$0xff] }
  0x4e   : > { %2033 = vmatprep.subr.bf16.mxu1 %v2176_v25  ;;  %v203_v25 = vld [vmem:[%s2366_s29 + $0x70] sm:$0xff] }
  0x50   : > { %2012 = vmatpush3.bf16.msra.mxu0 %v2177_v26  ;;  %v196_v26 = vld [vmem:[%s2366_s29 + $0x38] sm:$0xff] }
  0x51   : > { %2034 = vmatpush3.bf16.msra.mxu1 %v2178_v27  ;;  %2013 = vmatprep.subr.bf16.mxu0 %v2179_v28  ;;  %v1775_v27 = vcombine.low %v195_v24, %v203_v25  ;;  %v1776_v28 = vcombine.high %v195_v24, %v203_v25 }
  0x52   : > { %2035 = vmatprep.subr.bf16.mxu1 %v2180_v29  ;;  %v204_v29 = vld [vmem:[%s2366_s29 + $0x78] sm:$0xff]  ;;  %s1761_s29 = sshll.u32 %s2695_s21, 2 }
  0x53   : > { %s182_s19 = scalar_lea.vmem %s2692_s2, %s1761_s29 }
  0x54   : > { %2014 = vmatpush3.bf16.msra.mxu0 %v2181_v30  ;;  %v1777_v30 = vcombine.low %v196_v26, %v204_v29 }
  0x55   : > { %2036 = vmatpush3.bf16.msra.mxu1 %v2182_v31  ;;  %2015 = vmatprep.subr.bf16.mxu0 %v2183_v32  ;;  %v1778_v31 = vcombine.high %v196_v26, %v204_v29 }
  0x56   : > { %2037 = vmatprep.subr.bf16.mxu1 %v2184_v33 }
  0x58   : > { %2016 = vmatpush3.bf16.msra.mxu0 %v2185_v34 }
  0x59   : > { %2038 = vmatpush3.bf16.msra.mxu1 %v2186_v35  ;;  %2017 = vmatprep.subr.bf16.mxu0 %v2187_v36 }
  0x5a   : > { %2039 = vmatprep.subr.bf16.mxu1 %v2188_v37 }
  0x5c   : > { %2018 = vmatpush3.bf16.msra.mxu0 %v2189_v38 }
  0x5d   : > { %2040 = vmatpush3.bf16.msra.mxu1 %v2190_v39  ;;  %2019 = vmatprep.subr.bf16.mxu0 %v2191_v40 }
  0x5e   : > { %2041 = vmatprep.subr.bf16.mxu1 %v2192_v41 }
  0x60   : > { %2020 = vmatpush3.bf16.msra.mxu0 %v2193_v42 }
  0x61   : > { %2042 = vmatpush3.bf16.msra.mxu1 %v2194_v43  ;;  %2021 = vmatprep.subr.bf16.mxu0 %v2195_v44 }
  0x62   : > { %2043 = vmatprep.subr.bf16.mxu1 %v2196_v45 }
  0x64   : > { %2022 = vmatpush3.bf16.msra.mxu0 %v2197_v46 }
  0x65   : > { %2044 = vmatpush3.bf16.msra.mxu1 %v2198_v47  ;;  %2051 = vmatprep.subr.bf16.mxu0 %v2199_v56 }
  0x66   : > { %2073 = vmatprep.subr.bf16.mxu1 %v2200_v57 }
  0x67   : > { %1506 = vmatmul.mubr.bf16.vlgmr.msra.gmra.mrb[8].mxu0 %v1771_v52 }
  0x68   : > { %1547 = vmatmul.mubr.bf16.vlgmr.msra.gmra.mrb[8].mxu1 %v1773_v54  ;;  %2052 = vmatpush3.bf16.msra.mxu0 %v2201_v58 }
  0x69   : > { %2074 = vmatpush3.bf16.msra.mxu1 %v2202_v59  ;;  %2053 = vmatprep.subr.bf16.mxu0 %v2203_v60 }
  0x6a   : > { %2075 = vmatprep.subr.bf16.mxu1 %v2204_v61  ;;  %1587 = vmatprep.mubr.bf16.mxu0 %v1776_v28 }
  0x6b   : > { %1628 = vmatprep.mubr.bf16.mxu1 %v1778_v31 }
  0x6c   : > { %2054 = vmatpush3.bf16.msra.mxu0 %v2205_v62 }
  0x6d   : > { %2076 = vmatpush3.bf16.msra.mxu1 %v2206_v63  ;;  %2055 = vmatprep.subr.bf16.mxu0 %v2207_v0 }
  0x6e   : > { %2077 = vmatprep.subr.bf16.mxu1 %v2208_v1 }
  0x70   : > { %2056 = vmatpush3.bf16.msra.mxu0 %v2209_v2 }
  0x71   : > { %2078 = vmatpush3.bf16.msra.mxu1 %v2210_v3  ;;  %2057 = vmatprep.subr.bf16.mxu0 %v2211_v4 }
  0x72   : > { %2079 = vmatprep.subr.bf16.mxu1 %v2212_v5 }
  0x74   : > { %2058 = vmatpush3.bf16.msra.mxu0 %v2213_v6 }
  0x75   : > { %2080 = vmatpush3.bf16.msra.mxu1 %v2214_v7  ;;  %2059 = vmatprep.subr.bf16.mxu0 %v2215_v8 }
  0x76   : > { %2081 = vmatprep.subr.bf16.mxu1 %v2216_v9 }
  0x78   : > { %2060 = vmatpush3.bf16.msra.mxu0 %v2217_v10 }
  0x79   : > { %2082 = vmatpush3.bf16.msra.mxu1 %v2218_v11  ;;  %2061 = vmatprep.subr.bf16.mxu0 %v2219_v12 }
  0x7a   : > { %2083 = vmatprep.subr.bf16.mxu1 %v2220_v13 }
  0x7c   : > { %2062 = vmatpush3.bf16.msra.mxu0 %v2221_v14 }
  0x7d   : > { %2084 = vmatpush3.bf16.msra.mxu1 %v2222_v15  ;;  %2063 = vmatprep.subr.bf16.mxu0 %v2223_v16 }
  0x7e   : > { %2085 = vmatprep.subr.bf16.mxu1 %v2224_v17 }
  0x80   : > { %2064 = vmatpush3.bf16.msra.mxu0 %v2225_v18 }
  0x81   : > { %2086 = vmatpush3.bf16.msra.mxu1 %v2226_v19  ;;  %2065 = vmatprep.subr.bf16.mxu0 %v2227_v20 }
  0x82   : > { %2087 = vmatprep.subr.bf16.mxu1 %v2228_v21 }
  0x84   : > { %2066 = vmatpush3.bf16.msra.mxu0 %v2229_v22 }
  0x85   : > { %2088 = vmatpush3.bf16.msra.mxu1 %v2230_v23 }
  0x87   : > { %1588 = vmatmul.mubr.bf16.vlgmr.msra.gmra.mrb[12].mxu0 %v1775_v27 }
  0x88   : > { %1629 = vmatmul.mubr.bf16.vlgmr.msra.gmra.mrb[12].mxu1 %v1777_v30 }
  0xfa   : > { %v1935_v32 = vpop.f32.mrb[0].mxu0 }
  0xfb   : > { %v1957_v33 = vpop.f32.mrb[0].mxu1  ;;  %v1936_v34 = vpop.f32.mrb[1].mxu0 }
  0xfc   : > { %v1937_v35 = vadd.f32 %v1936_v34, %v1935_v32  ;;  %v1958_v36 = vpop.f32.mrb[1].mxu1  ;;  %v1938_v37 = vpop.f32.mrb[2].mxu0 }
  0xfd   : > { %v1959_v38 = vadd.f32 %v1958_v36, %v1957_v33  ;;  %v1960_v39 = vpop.f32.mrb[2].mxu1  ;;  %v1939_v40 = vpop.f32.mrb[3].mxu0 }
  0xfe   : > { %v1940_v41 = vadd.f32 %v1939_v40, %v1938_v37  ;;  %v1961_v42 = vpop.f32.mrb[3].mxu1 }
  0xff   : > { %v1385_v43 = vadd.f32 %v1959_v38, %v1937_v35  ;;  %v1962_v44 = vadd.f32 %v1961_v42, %v1960_v39 }
 0x101   : > { %v1388_v45 = vadd.f32 %v1962_v44, %v1940_v41 }
 0x11a   : > { %v1979_v46 = vpop.f32.mrb[4].mxu0 }
 0x11b   : > { %v2001_v47 = vpop.f32.mrb[4].mxu1  ;;  %v1980_v48 = vpop.f32.mrb[5].mxu0 }
 0x11c   : > { %v1981_v49 = vadd.f32 %v1980_v48, %v1979_v46  ;;  %v2002_v50 = vpop.f32.mrb[5].mxu1  ;;  %v1982_v51 = vpop.f32.mrb[6].mxu0 }
 0x11d   : > { %v2003_v52 = vadd.f32 %v2002_v50, %v2001_v47  ;;  %v2004_v53 = vpop.f32.mrb[6].mxu1  ;;  %v1983_v54 = vpop.f32.mrb[7].mxu0 }
 0x11e   : > { %v1426_v55 = vadd.f32 %v1981_v49, %v1385_v43  ;;  %v1984_v56 = vadd.f32 %v1983_v54, %v1982_v51  ;;  %v2005_v57 = vpop.f32.mrb[7].mxu1 }
 0x11f   : > { %v2006_v58 = vadd.f32 %v2005_v57, %v2004_v53 }
 0x120   : > { %v1467_v59 = vadd.f32 %v2003_v52, %v1426_v55  ;;  %v1429_v60 = vadd.f32 %v1984_v56, %v1388_v45 }
 0x122   : > { %v1470_v61 = vadd.f32 %v2006_v58, %v1429_v60 }
 0x13a   : > { %v2023_v62 = vpop.f32.mrb[8].mxu0 }
 0x13b   : > { %v2045_v63 = vpop.f32.mrb[8].mxu1  ;;  %v2024_v0 = vpop.f32.mrb[9].mxu0 }
 0x13c   : > { %v2046_v1 = vpop.f32.mrb[9].mxu1  ;;  %v2025_v2 = vadd.f32 %v2024_v0, %v2023_v62  ;;  %v2026_v4 = vpop.f32.mrb[10].mxu0 }
 0x13d   : > { %v2047_v3 = vadd.f32 %v2046_v1, %v2045_v63  ;;  %v2048_v5 = vpop.f32.mrb[10].mxu1  ;;  %v2027_v6 = vpop.f32.mrb[11].mxu0 }
 0x13e   : > { %v2049_v7 = vpop.f32.mrb[11].mxu1  ;;  %v1508_v8 = vadd.f32 %v2025_v2, %v1467_v59  ;;  %v2028_v9 = vadd.f32 %v2027_v6, %v2026_v4 }
 0x13f   : > { %v2050_v10 = vadd.f32 %v2049_v7, %v2048_v5 }
 0x140   : > { %v1549_v11 = vadd.f32 %v2047_v3, %v1508_v8  ;;  %v1511_v12 = vadd.f32 %v2028_v9, %v1470_v61 }
 0x142   : > { %v1552_v13 = vadd.f32 %v2050_v10, %v1511_v12 }
 0x15a   : > { %v2067_v14 = vpop.f32.mrb[12].mxu0 }
 0x15b   : > { %v2089_v15 = vpop.f32.mrb[12].mxu1  ;;  %v2068_v16 = vpop.f32.mrb[13].mxu0 }
 0x15c   : > { %v2069_v17 = vadd.f32 %v2068_v16, %v2067_v14  ;;  %v2090_v18 = vpop.f32.mrb[13].mxu1  ;;  %v2070_v19 = vpop.f32.mrb[14].mxu0 }
 0x15d   : > { %v2091_v20 = vadd.f32 %v2090_v18, %v2089_v15  ;;  %v2092_v21 = vpop.f32.mrb[14].mxu1  ;;  %v2071_v22 = vpop.f32.mrb[15].mxu0 }
 0x15e   : > { %v1590_v23 = vadd.f32 %v2069_v17, %v1549_v11  ;;  %v2072_v24 = vadd.f32 %v2071_v22, %v2070_v19  ;;  %v2093_v25 = vpop.f32.mrb[15].mxu1 }
 0x15f   : > { %v2094_v26 = vadd.f32 %v2093_v25, %v2092_v21 }
 0x160   : > { %v1631_v27 = vadd.f32 %v2091_v20, %v1590_v23  ;;  %v1593_v28 = vadd.f32 %v2072_v24, %v1552_v13 }
 0x162   : > { %v1634_v29 = vadd.f32 %v2094_v26, %v1593_v28  ;;  %v1655_v30 = vmul.f32 %v1631_v27, %v1631_v27 }
 0x164   : > { %v1917_v31 = vpack.c.bf16 %v1634_v29, %v1631_v27  ;;  %v1647_v32 = vadd.f32 %v1634_v29, %v1631_v27  ;;  %v1656_v33 = vmul.f32 %v1634_v29, %v1634_v29 }
 0x166   : > { %1918 = vst [vmem:[%s182_s19] sm:$0xff] %v1917_v31   ;;  %v1648_v34 = vrot.slane %v1647_v32, 4  ;;  %v1657_v35 = vadd.f32 %v1656_v33, %v1655_v30 }
 0x168   : > { %v1649_v36 = vadd.f32 %v1648_v34, %v1647_v32  ;;  %v1658_v37 = vrot.slane %v1657_v35, 4 }
 0x16a   : > { %v1650_v38 = vrot.slane %v1649_v36, 2  ;;  %v1659_v39 = vadd.f32 %v1658_v37, %v1657_v35 }
 0x16c   : > { %v1651_v40 = vadd.f32 %v1650_v38, %v1649_v36  ;;  %v1660_v41 = vrot.slane %v1659_v39, 2 }
 0x16e   : > { %v1652_v42 = vrot.slane %v1651_v40, 1  ;;  %v1661_v43 = vadd.f32 %v1660_v41, %v1659_v39 }
 0x170   : > { %v1653_v44 = vadd.f32 %v1652_v42, %v1651_v40  ;;  %v1662_v45 = vrot.slane %v1661_v43, 1 }
 0x172   : > { %1654 = vst [vmem:[%s187_s23] sm:$0x1] %v1653_v44  ;;  %v1663_v46 = vadd.f32 %v1662_v45, %v1661_v43 }
 0x174   : > { %1664 = vst [vmem:[%s187_s23 + $0x1] sm:$0x1] %v1663_v46 }
 0x175 PF: > { %s14_s12 = sadd.s32 1, %s2237_s12  }
 0x176   : > { %p11_p5 = scmp.ge.s32.totalorder %s14_s12, 4  }
 0x178   :  { %13 = sbr.rel (!%p11_p5) target bundleno = 1 (0x1), region = 70 }

// kernel: discriminator_forward.12
= control target key start
LH: loop header
LB: loop body
LE: loop exit
PB: predicated region body
PF: predicated region fallthrough
CT: control target
= control target key end

     0   :  { %s103_s0 = inlined_call_operand.vmem [shape: bf16[16,128], index: 0, kind: input, shape index: {}]   ;;  %s104_s1 = inlined_call_operand.vmem [shape: f32[1,128], index: 1, kind: input, shape index: {}]   ;;  %s105_s2 = inlined_call_operand.vmem [shape: f32[1,128], index: 2, kind: input, shape index: {}]   ;;  %s106_s3 = inlined_call_operand.vmem [shape: bf16[16,128], index: 3, kind: output, shape index: {}]  }
   0x1   :  { %v63_v0 = vld [vmem:[%s103_s0] sm:$0xff]  }
   0x2   :  { %v56_v1 = vld [vmem:[%s104_s1] ss:$0 sm:$0xff]  ;;  %v64_v2 = vunpack.c.l.bf16 %v63_v0  ;;  %v65_v3 = vunpack.c.h.bf16 %v63_v0 }
   0x3   :  { %v57_v4 = vld [vmem:[%s105_s2] ss:$0 sm:$0xff] }
   0x4   :  { %v25_v5 = vmul.f32 %v64_v2, %v56_v1  ;;  %v26_v6 = vmul.f32 %v65_v3, %v56_v1 }
   0x6   :  { %v34_v7 = vadd.f32 %v57_v4, %v25_v5  ;;  %v35_v8 = vadd.f32 %v57_v4, %v26_v6 }
   0x8   :  { %vm36_vm0 = vcmp.ge.f32.partialorder %v34_v7, 0.0  ;;  %vm37_vm1 = vcmp.ge.f32.partialorder %v35_v8, 0.0  ;;  %v38_v9 = vmul.f32 0.2, %v34_v7  ;;  %v39_v10 = vmul.f32 0.2, %v35_v8 }
   0xa   :  { %v40_v11 = vsel %vm36_vm0, %v34_v7, %v38_v9  ;;  %v41_v12 = vsel %vm37_vm1, %v35_v8, %v39_v10 }
   0xb   :  { %v69_v13 = vpack.c.bf16 %v41_v12, %v40_v11 }
   0xd   :  { %70 = vst [vmem:[%s106_s3] sm:$0xff] %v69_v13  }

// kernel: discriminator_forward.11
= control target key start
LH: loop header
LB: loop body
LE: loop exit
PB: predicated region body
PF: predicated region fallthrough
CT: control target
= control target key end

     0   :  { %s2416_s1 = inlined_call_operand.vmem [shape: bf16[2048,128], index: 1, kind: input, shape index: {}]   ;;  %s2417_s0 = inlined_call_operand.vmem [shape: bf16[16,2048], index: 0, kind: input, shape index: {}]   ;;  %s2418_s2 = inlined_call_operand.vmem [shape: bf16[16,128], index: 2, kind: output, shape index: {0}]   ;;  %s2419_s3 = inlined_call_operand.vmem [shape: f32[1,2,128], index: 3, kind: output, shape index: {1}]  }
   0x1   :  { %v1827_v0 = vld [vmem:[%s2416_s1 + $0x40] sm:$0xff]   ;;  %v1831_v4 = vld [vmem:[%s2416_s1 + $0x48] sm:$0xff]   ;;  %v1835_v8 = vld [vmem:[%s2416_s1 + $0x50] sm:$0xff]  }
   0x2   :  { %v1828_v1 = vld [vmem:[%s2416_s1 + $0xc0] sm:$0xff]   ;;  %1651 = vmatprep.subr.bf16.mxu0 %v1827_v0  ;;  %v1832_v5 = vld [vmem:[%s2416_s1 + $0xc8] sm:$0xff]   ;;  %v1836_v9 = vld [vmem:[%s2416_s1 + $0xd0] sm:$0xff]  }
   0x3   :  { %v1829_v2 = vld [vmem:[%s2416_s1] sm:$0xff]   ;;  %1673 = vmatprep.subr.bf16.mxu1 %v1828_v1  ;;  %v1833_v6 = vld [vmem:[%s2416_s1 + $0x8] sm:$0xff]   ;;  %v1837_v10 = vld [vmem:[%s2416_s1 + $0x10] sm:$0xff]  }
   0x4   :  { %v1830_v3 = vld [vmem:[%s2416_s1 + $0x80] sm:$0xff]   ;;  %1652 = vmatpush3.bf16.msra.mxu0 %v1829_v2  ;;  %v1834_v7 = vld [vmem:[%s2416_s1 + $0x88] sm:$0xff]   ;;  %v1838_v11 = vld [vmem:[%s2416_s1 + $0x90] sm:$0xff]  }
   0x5   :  { %1674 = vmatpush3.bf16.msra.mxu1 %v1830_v3  ;;  %1653 = vmatprep.subr.bf16.mxu0 %v1831_v4  ;;  %v1839_v12 = vld [vmem:[%s2416_s1 + $0x58] sm:$0xff]   ;;  %v1843_v16 = vld [vmem:[%s2416_s1 + $0x60] sm:$0xff]   ;;  %v1847_v20 = vld [vmem:[%s2416_s1 + $0x68] sm:$0xff]  }
   0x6   :  { %1675 = vmatprep.subr.bf16.mxu1 %v1832_v5  ;;  %v1840_v13 = vld [vmem:[%s2416_s1 + $0xd8] sm:$0xff]   ;;  %v1844_v17 = vld [vmem:[%s2416_s1 + $0xe0] sm:$0xff]   ;;  %v1848_v21 = vld [vmem:[%s2416_s1 + $0xe8] sm:$0xff]  }
   0x7   :  { %v1841_v14 = vld [vmem:[%s2416_s1 + $0x18] sm:$0xff]   ;;  %v1845_v18 = vld [vmem:[%s2416_s1 + $0x20] sm:$0xff]   ;;  %v1849_v22 = vld [vmem:[%s2416_s1 + $0x28] sm:$0xff]  }
   0x8   :  { %1654 = vmatpush3.bf16.msra.mxu0 %v1833_v6  ;;  %v1842_v15 = vld [vmem:[%s2416_s1 + $0x98] sm:$0xff]   ;;  %v1846_v19 = vld [vmem:[%s2416_s1 + $0xa0] sm:$0xff]   ;;  %v1850_v23 = vld [vmem:[%s2416_s1 + $0xa8] sm:$0xff]  }
   0x9   :  { %1676 = vmatpush3.bf16.msra.mxu1 %v1834_v7  ;;  %1655 = vmatprep.subr.bf16.mxu0 %v1835_v8  ;;  %v1851_v24 = vld [vmem:[%s2416_s1 + $0x70] sm:$0xff]   ;;  %v1855_v28 = vld [vmem:[%s2416_s1 + $0x78] sm:$0xff]   ;;  %v14_v32 = vld [vmem:[%s2417_s0] sm:$0xff] }
   0xa   :  { %1677 = vmatprep.subr.bf16.mxu1 %v1836_v9  ;;  %v1852_v25 = vld [vmem:[%s2416_s1 + $0xf0] sm:$0xff]   ;;  %v1856_v29 = vld [vmem:[%s2416_s1 + $0xf8] sm:$0xff]   ;;  %v22_v33 = vld [vmem:[%s2417_s0 + $0x40] sm:$0xff] }
   0xb   :  { %v1853_v26 = vld [vmem:[%s2416_s1 + $0x30] sm:$0xff]   ;;  %v1857_v30 = vld [vmem:[%s2416_s1 + $0x38] sm:$0xff]   ;;  %v15_v34 = vld [vmem:[%s2417_s0 + $0x8] sm:$0xff]  ;;  %v1498_v35 = vcombine.low %v14_v32, %v22_v33  ;;  %v1499_v36 = vcombine.high %v14_v32, %v22_v33 }
   0xc   :  { %1656 = vmatpush3.bf16.msra.mxu0 %v1837_v10  ;;  %v1854_v27 = vld [vmem:[%s2416_s1 + $0xb0] sm:$0xff]   ;;  %v1858_v31 = vld [vmem:[%s2416_s1 + $0xb8] sm:$0xff]   ;;  %v23_v37 = vld [vmem:[%s2417_s0 + $0x48] sm:$0xff] }
   0xd   :  { %1678 = vmatpush3.bf16.msra.mxu1 %v1838_v11  ;;  %1657 = vmatprep.subr.bf16.mxu0 %v1839_v12  ;;  %v1500_v38 = vcombine.low %v15_v34, %v23_v37  ;;  %v1501_v39 = vcombine.high %v15_v34, %v23_v37  ;;  %v1859_v40 = vld [vmem:[%s2416_s1 + $0x140] sm:$0xff]   ;;  %v1863_v44 = vld [vmem:[%s2416_s1 + $0x148] sm:$0xff]   ;;  %v1867_v48 = vld [vmem:[%s2416_s1 + $0x150] sm:$0xff]  }
   0xe   :  { %1679 = vmatprep.subr.bf16.mxu1 %v1840_v13  ;;  %1166 = vmatprep.mubr.bf16.mxu0 %v1499_v36  ;;  %v1860_v41 = vld [vmem:[%s2416_s1 + $0x1c0] sm:$0xff]   ;;  %v1864_v45 = vld [vmem:[%s2416_s1 + $0x1c8] sm:$0xff]   ;;  %v1868_v49 = vld [vmem:[%s2416_s1 + $0x1d0] sm:$0xff]  }
   0xf   :  { %1207 = vmatprep.mubr.bf16.mxu1 %v1501_v39  ;;  %v1861_v42 = vld [vmem:[%s2416_s1 + $0x100] sm:$0xff]   ;;  %v1865_v46 = vld [vmem:[%s2416_s1 + $0x108] sm:$0xff]   ;;  %v1869_v50 = vld [vmem:[%s2416_s1 + $0x110] sm:$0xff]  }
  0x10   :  { %1658 = vmatpush3.bf16.msra.mxu0 %v1841_v14  ;;  %v1862_v43 = vld [vmem:[%s2416_s1 + $0x180] sm:$0xff]   ;;  %v1866_v47 = vld [vmem:[%s2416_s1 + $0x188] sm:$0xff]   ;;  %v1870_v51 = vld [vmem:[%s2416_s1 + $0x190] sm:$0xff]  }
  0x11   :  { %1680 = vmatpush3.bf16.msra.mxu1 %v1842_v15  ;;  %1659 = vmatprep.subr.bf16.mxu0 %v1843_v16  ;;  %v1871_v52 = vld [vmem:[%s2416_s1 + $0x158] sm:$0xff]   ;;  %v1875_v56 = vld [vmem:[%s2416_s1 + $0x160] sm:$0xff]   ;;  %v1879_v60 = vld [vmem:[%s2416_s1 + $0x168] sm:$0xff]  }
  0x12   :  { %1681 = vmatprep.subr.bf16.mxu1 %v1844_v17  ;;  %v1872_v53 = vld [vmem:[%s2416_s1 + $0x1d8] sm:$0xff]   ;;  %v1876_v57 = vld [vmem:[%s2416_s1 + $0x1e0] sm:$0xff]   ;;  %v1880_v61 = vld [vmem:[%s2416_s1 + $0x1e8] sm:$0xff]  }
  0x13   :  { %v1873_v54 = vld [vmem:[%s2416_s1 + $0x118] sm:$0xff]   ;;  %v1877_v58 = vld [vmem:[%s2416_s1 + $0x120] sm:$0xff]   ;;  %v1881_v62 = vld [vmem:[%s2416_s1 + $0x128] sm:$0xff]  }
  0x14   :  { %1660 = vmatpush3.bf16.msra.mxu0 %v1845_v18  ;;  %v1874_v55 = vld [vmem:[%s2416_s1 + $0x198] sm:$0xff]   ;;  %v1878_v59 = vld [vmem:[%s2416_s1 + $0x1a0] sm:$0xff]   ;;  %v1882_v63 = vld [vmem:[%s2416_s1 + $0x1a8] sm:$0xff]  }
  0x15   :  { %1682 = vmatpush3.bf16.msra.mxu1 %v1846_v19  ;;  %1661 = vmatprep.subr.bf16.mxu0 %v1847_v20  ;;  %v1883_v0 = vld [vmem:[%s2416_s1 + $0x170] sm:$0xff]   ;;  %v1887_v4 = vld [vmem:[%s2416_s1 + $0x178] sm:$0xff]   ;;  %v1891_v16 = vld [vmem:[%s2416_s1 + $0x240] sm:$0xff]  }
  0x16   :  { %1683 = vmatprep.subr.bf16.mxu1 %v1848_v21  ;;  %v1884_v1 = vld [vmem:[%s2416_s1 + $0x1f0] sm:$0xff]   ;;  %v1888_v5 = vld [vmem:[%s2416_s1 + $0x1f8] sm:$0xff]   ;;  %v1892_v17 = vld [vmem:[%s2416_s1 + $0x2c0] sm:$0xff]  }
  0x17   :  { %v1885_v2 = vld [vmem:[%s2416_s1 + $0x130] sm:$0xff]   ;;  %v1889_v6 = vld [vmem:[%s2416_s1 + $0x138] sm:$0xff]   ;;  %v1893_v18 = vld [vmem:[%s2416_s1 + $0x200] sm:$0xff]  }
  0x18   :  { %1662 = vmatpush3.bf16.msra.mxu0 %v1849_v22  ;;  %v1886_v3 = vld [vmem:[%s2416_s1 + $0x1b0] sm:$0xff]   ;;  %v1890_v7 = vld [vmem:[%s2416_s1 + $0x1b8] sm:$0xff]   ;;  %v1894_v19 = vld [vmem:[%s2416_s1 + $0x280] sm:$0xff]  }
  0x19   :  { %1684 = vmatpush3.bf16.msra.mxu1 %v1850_v23  ;;  %1663 = vmatprep.subr.bf16.mxu0 %v1851_v24  ;;  %v16_v8 = vld [vmem:[%s2417_s0 + $0x10] sm:$0xff]  ;;  %v17_v12 = vld [vmem:[%s2417_s0 + $0x18] sm:$0xff]  ;;  %v1895_v20 = vld [vmem:[%s2416_s1 + $0x248] sm:$0xff]  }
  0x1a   :  { %1685 = vmatprep.subr.bf16.mxu1 %v1852_v25  ;;  %v24_v9 = vld [vmem:[%s2417_s0 + $0x50] sm:$0xff]  ;;  %v25_v13 = vld [vmem:[%s2417_s0 + $0x58] sm:$0xff]  ;;  %v1896_v21 = vld [vmem:[%s2416_s1 + $0x2c8] sm:$0xff]  }
  0x1b   :  { %v1502_v10 = vcombine.low %v16_v8, %v24_v9  ;;  %v1503_v11 = vcombine.high %v16_v8, %v24_v9  ;;  %v1504_v14 = vcombine.low %v17_v12, %v25_v13  ;;  %v1505_v15 = vcombine.high %v17_v12, %v25_v13  ;;  %v1897_v22 = vld [vmem:[%s2416_s1 + $0x208] sm:$0xff]   ;;  %v1899_v24 = vld [vmem:[%s2416_s1 + $0x250] sm:$0xff]   ;;  %v1907_v32 = vld [vmem:[%s2416_s1 + $0x260] sm:$0xff]  }
  0x1c   :  { %1664 = vmatpush3.bf16.msra.mxu0 %v1853_v26  ;;  %v1898_v23 = vld [vmem:[%s2416_s1 + $0x288] sm:$0xff]   ;;  %v1900_v25 = vld [vmem:[%s2416_s1 + $0x2d0] sm:$0xff]   ;;  %v1908_v33 = vld [vmem:[%s2416_s1 + $0x2e0] sm:$0xff]  }
  0x1d   :  { %1686 = vmatpush3.bf16.msra.mxu1 %v1854_v27  ;;  %1665 = vmatprep.subr.bf16.mxu0 %v1855_v28  ;;  %v1901_v26 = vld [vmem:[%s2416_s1 + $0x210] sm:$0xff]   ;;  %v1903_v28 = vld [vmem:[%s2416_s1 + $0x258] sm:$0xff]   ;;  %v1909_v34 = vld [vmem:[%s2416_s1 + $0x220] sm:$0xff]  }
  0x1e   :  { %1687 = vmatprep.subr.bf16.mxu1 %v1856_v29  ;;  %v1902_v27 = vld [vmem:[%s2416_s1 + $0x290] sm:$0xff]   ;;  %v1904_v29 = vld [vmem:[%s2416_s1 + $0x2d8] sm:$0xff]   ;;  %v1911_v36 = vld [vmem:[%s2416_s1 + $0x268] sm:$0xff]  }
  0x1f   :  { %v1912_v37 = vld [vmem:[%s2416_s1 + $0x2e8] sm:$0xff]   ;;  %v1939_v8 = vld [vmem:[%s2416_s1 + $0x360] sm:$0xff]  }
  0x20   :  { %1666 = vmatpush3.bf16.msra.mxu0 %v1857_v30  ;;  %v1905_v30 = vld [vmem:[%s2416_s1 + $0x218] sm:$0xff]   ;;  %v1914_v39 = vld [vmem:[%s2416_s1 + $0x2a8] sm:$0xff]   ;;  %v1940_v9 = vld [vmem:[%s2416_s1 + $0x3e0] sm:$0xff]  }
  0x21   :  { %1688 = vmatpush3.bf16.msra.mxu1 %v1858_v31  ;;  %1695 = vmatprep.subr.bf16.mxu0 %v1859_v40  ;;  %v1906_v31 = vld [vmem:[%s2416_s1 + $0x298] sm:$0xff]   ;;  %v1915_v40 = vld [vmem:[%s2416_s1 + $0x270] sm:$0xff]   ;;  %v1943_v12 = vld [vmem:[%s2416_s1 + $0x368] sm:$0xff]  }
  0x22   :  { %1717 = vmatprep.subr.bf16.mxu1 %v1860_v41  ;;  %v1916_v41 = vld [vmem:[%s2416_s1 + $0x2f0] sm:$0xff]   ;;  %v1944_v13 = vld [vmem:[%s2416_s1 + $0x3e8] sm:$0xff]  }
  0x23   :  { %1167 = vmatmul.mubr.bf16.vlgmr.msra.gmra.mrb[0].mxu0 %v1498_v35  ;;  %v1910_v35 = vld [vmem:[%s2416_s1 + $0x2a0] sm:$0xff]  }
  0x24   :  { %1208 = vmatmul.mubr.bf16.vlgmr.msra.gmra.mrb[0].mxu1 %v1500_v38  ;;  %1696 = vmatpush3.bf16.msra.mxu0 %v1861_v42  ;;  %v1913_v38 = vld [vmem:[%s2416_s1 + $0x228] sm:$0xff]   ;;  %v1917_v42 = vld [vmem:[%s2416_s1 + $0x230] sm:$0xff]  }
  0x25   :  { %1718 = vmatpush3.bf16.msra.mxu1 %v1862_v43  ;;  %1697 = vmatprep.subr.bf16.mxu0 %v1863_v44  ;;  %v1918_v43 = vld [vmem:[%s2416_s1 + $0x2b0] sm:$0xff]   ;;  %v1919_v44 = vld [vmem:[%s2416_s1 + $0x278] sm:$0xff]  }
  0x26   :  { %1719 = vmatprep.subr.bf16.mxu1 %v1864_v45  ;;  %1248 = vmatprep.mubr.bf16.mxu0 %v1503_v11  ;;  %v1920_v45 = vld [vmem:[%s2416_s1 + $0x2f8] sm:$0xff]   ;;  %v1942_v11 = vld [vmem:[%s2416_s1 + $0x3a0] sm:$0xff]  }
  0x27   :  { %1289 = vmatprep.mubr.bf16.mxu1 %v1505_v15  ;;  %v1946_v15 = vld [vmem:[%s2416_s1 + $0x3a8] sm:$0xff]  }
  0x28   :  { %1698 = vmatpush3.bf16.msra.mxu0 %v1865_v46  ;;  %v1921_v46 = vld [vmem:[%s2416_s1 + $0x238] sm:$0xff]  }
  0x29   :  { %1720 = vmatpush3.bf16.msra.mxu1 %v1866_v47  ;;  %1699 = vmatprep.subr.bf16.mxu0 %v1867_v48  ;;  %v1922_v47 = vld [vmem:[%s2416_s1 + $0x2b8] sm:$0xff]   ;;  %v18_v48 = vld [vmem:[%s2417_s0 + $0x20] sm:$0xff] }
  0x2a   :  { %1721 = vmatprep.subr.bf16.mxu1 %v1868_v49  ;;  %v26_v49 = vld [vmem:[%s2417_s0 + $0x60] sm:$0xff] }
  0x2c   :  { %1700 = vmatpush3.bf16.msra.mxu0 %v1869_v50  ;;  %v19_v50 = vld [vmem:[%s2417_s0 + $0x28] sm:$0xff] }
  0x2d   :  { %1722 = vmatpush3.bf16.msra.mxu1 %v1870_v51  ;;  %1701 = vmatprep.subr.bf16.mxu0 %v1871_v52  ;;  %v27_v51 = vld [vmem:[%s2417_s0 + $0x68] sm:$0xff]  ;;  %v1506_v52 = vcombine.low %v18_v48, %v26_v49 }
  0x2e   :  { %1723 = vmatprep.subr.bf16.mxu1 %v1872_v53  ;;  %v1507_v53 = vcombine.high %v18_v48, %v26_v49 }
  0x30   :  { %1702 = vmatpush3.bf16.msra.mxu0 %v1873_v54  ;;  %v1508_v54 = vcombine.low %v19_v50, %v27_v51 }
  0x31   :  { %1724 = vmatpush3.bf16.msra.mxu1 %v1874_v55  ;;  %1703 = vmatprep.subr.bf16.mxu0 %v1875_v56  ;;  %v1509_v55 = vcombine.high %v19_v50, %v27_v51  ;;  %v1923_v56 = vld [vmem:[%s2416_s1 + $0x340] sm:$0xff]  }
  0x32   :  { %1725 = vmatprep.subr.bf16.mxu1 %v1876_v57  ;;  %v1924_v57 = vld [vmem:[%s2416_s1 + $0x3c0] sm:$0xff]  }
  0x34   :  { %1704 = vmatpush3.bf16.msra.mxu0 %v1877_v58  ;;  %v1925_v58 = vld [vmem:[%s2416_s1 + $0x300] sm:$0xff]  }
  0x35   :  { %1726 = vmatpush3.bf16.msra.mxu1 %v1878_v59  ;;  %1705 = vmatprep.subr.bf16.mxu0 %v1879_v60  ;;  %v1926_v59 = vld [vmem:[%s2416_s1 + $0x380] sm:$0xff]   ;;  %v1927_v60 = vld [vmem:[%s2416_s1 + $0x348] sm:$0xff]  }
  0x36   :  { %1727 = vmatprep.subr.bf16.mxu1 %v1880_v61  ;;  %v1928_v61 = vld [vmem:[%s2416_s1 + $0x3c8] sm:$0xff]  }
  0x38   :  { %1706 = vmatpush3.bf16.msra.mxu0 %v1881_v62  ;;  %v1929_v62 = vld [vmem:[%s2416_s1 + $0x308] sm:$0xff]  }
  0x39   :  { %1728 = vmatpush3.bf16.msra.mxu1 %v1882_v63  ;;  %1707 = vmatprep.subr.bf16.mxu0 %v1883_v0  ;;  %v1930_v63 = vld [vmem:[%s2416_s1 + $0x388] sm:$0xff]   ;;  %v1931_v0 = vld [vmem:[%s2416_s1 + $0x350] sm:$0xff]  }
  0x3a   :  { %1729 = vmatprep.subr.bf16.mxu1 %v1884_v1  ;;  %v1932_v1 = vld [vmem:[%s2416_s1 + $0x3d0] sm:$0xff]  }
  0x3c   :  { %1708 = vmatpush3.bf16.msra.mxu0 %v1885_v2  ;;  %v1933_v2 = vld [vmem:[%s2416_s1 + $0x310] sm:$0xff]  }
  0x3d   :  { %1730 = vmatpush3.bf16.msra.mxu1 %v1886_v3  ;;  %1709 = vmatprep.subr.bf16.mxu0 %v1887_v4  ;;  %v1934_v3 = vld [vmem:[%s2416_s1 + $0x390] sm:$0xff]   ;;  %v1935_v4 = vld [vmem:[%s2416_s1 + $0x358] sm:$0xff]  }
  0x3e   :  { %1731 = vmatprep.subr.bf16.mxu1 %v1888_v5  ;;  %v1936_v5 = vld [vmem:[%s2416_s1 + $0x3d8] sm:$0xff]  }
  0x40   :  { %1710 = vmatpush3.bf16.msra.mxu0 %v1889_v6  ;;  %v1937_v6 = vld [vmem:[%s2416_s1 + $0x318] sm:$0xff]  }
  0x41   :  { %1732 = vmatpush3.bf16.msra.mxu1 %v1890_v7  ;;  %1739 = vmatprep.subr.bf16.mxu0 %v1891_v16  ;;  %v1938_v7 = vld [vmem:[%s2416_s1 + $0x398] sm:$0xff]   ;;  %v1947_v16 = vld [vmem:[%s2416_s1 + $0x370] sm:$0xff]  }
  0x42   :  { %1761 = vmatprep.subr.bf16.mxu1 %v1892_v17  ;;  %v1948_v17 = vld [vmem:[%s2416_s1 + $0x3f0] sm:$0xff]  }
  0x43   :  { %1249 = vmatmul.mubr.bf16.vlgmr.msra.gmra.mrb[4].mxu0 %v1502_v10  ;;  %v1941_v10 = vld [vmem:[%s2416_s1 + $0x320] sm:$0xff]  }
  0x44   :  { %1290 = vmatmul.mubr.bf16.vlgmr.msra.gmra.mrb[4].mxu1 %v1504_v14  ;;  %1740 = vmatpush3.bf16.msra.mxu0 %v1893_v18  ;;  %v1945_v14 = vld [vmem:[%s2416_s1 + $0x328] sm:$0xff]   ;;  %v1949_v18 = vld [vmem:[%s2416_s1 + $0x330] sm:$0xff]  }
  0x45   :  { %1762 = vmatpush3.bf16.msra.mxu1 %v1894_v19  ;;  %1741 = vmatprep.subr.bf16.mxu0 %v1895_v20  ;;  %v1950_v19 = vld [vmem:[%s2416_s1 + $0x3b0] sm:$0xff]   ;;  %v1951_v20 = vld [vmem:[%s2416_s1 + $0x378] sm:$0xff]  }
  0x46   :  { %1763 = vmatprep.subr.bf16.mxu1 %v1896_v21  ;;  %1330 = vmatprep.mubr.bf16.mxu0 %v1507_v53  ;;  %v1952_v21 = vld [vmem:[%s2416_s1 + $0x3f8] sm:$0xff]  }
  0x47   :  { %1371 = vmatprep.mubr.bf16.mxu1 %v1509_v55 }
  0x48   :  { %1742 = vmatpush3.bf16.msra.mxu0 %v1897_v22  ;;  %v1953_v22 = vld [vmem:[%s2416_s1 + $0x338] sm:$0xff]  }
  0x49   :  { %1764 = vmatpush3.bf16.msra.mxu1 %v1898_v23  ;;  %1743 = vmatprep.subr.bf16.mxu0 %v1899_v24  ;;  %v1954_v23 = vld [vmem:[%s2416_s1 + $0x3b8] sm:$0xff]   ;;  %v20_v24 = vld [vmem:[%s2417_s0 + $0x30] sm:$0xff] }
  0x4a   :  { %1765 = vmatprep.subr.bf16.mxu1 %v1900_v25  ;;  %v28_v25 = vld [vmem:[%s2417_s0 + $0x70] sm:$0xff] }
  0x4c   :  { %1744 = vmatpush3.bf16.msra.mxu0 %v1901_v26  ;;  %v21_v26 = vld [vmem:[%s2417_s0 + $0x38] sm:$0xff] }
  0x4d   :  { %1766 = vmatpush3.bf16.msra.mxu1 %v1902_v27  ;;  %1745 = vmatprep.subr.bf16.mxu0 %v1903_v28  ;;  %v1510_v27 = vcombine.low %v20_v24, %v28_v25  ;;  %v1511_v28 = vcombine.high %v20_v24, %v28_v25 }
  0x4e   :  { %1767 = vmatprep.subr.bf16.mxu1 %v1904_v29  ;;  %v29_v29 = vld [vmem:[%s2417_s0 + $0x78] sm:$0xff] }
  0x50   :  { %1746 = vmatpush3.bf16.msra.mxu0 %v1905_v30  ;;  %v1512_v30 = vcombine.low %v21_v26, %v29_v29 }
  0x51   :  { %1768 = vmatpush3.bf16.msra.mxu1 %v1906_v31  ;;  %1747 = vmatprep.subr.bf16.mxu0 %v1907_v32  ;;  %v1513_v31 = vcombine.high %v21_v26, %v29_v29 }
  0x52   :  { %1769 = vmatprep.subr.bf16.mxu1 %v1908_v33 }
  0x54   :  { %1748 = vmatpush3.bf16.msra.mxu0 %v1909_v34 }
  0x55   :  { %1770 = vmatpush3.bf16.msra.mxu1 %v1910_v35  ;;  %1749 = vmatprep.subr.bf16.mxu0 %v1911_v36 }
  0x56   :  { %1771 = vmatprep.subr.bf16.mxu1 %v1912_v37 }
  0x58   :  { %1750 = vmatpush3.bf16.msra.mxu0 %v1913_v38 }
  0x59   :  { %1772 = vmatpush3.bf16.msra.mxu1 %v1914_v39  ;;  %1751 = vmatprep.subr.bf16.mxu0 %v1915_v40 }
  0x5a   :  { %1773 = vmatprep.subr.bf16.mxu1 %v1916_v41 }
  0x5c   :  { %1752 = vmatpush3.bf16.msra.mxu0 %v1917_v42 }
  0x5d   :  { %1774 = vmatpush3.bf16.msra.mxu1 %v1918_v43  ;;  %1753 = vmatprep.subr.bf16.mxu0 %v1919_v44 }
  0x5e   :  { %1775 = vmatprep.subr.bf16.mxu1 %v1920_v45 }
  0x60   :  { %1754 = vmatpush3.bf16.msra.mxu0 %v1921_v46 }
  0x61   :  { %1776 = vmatpush3.bf16.msra.mxu1 %v1922_v47  ;;  %1783 = vmatprep.subr.bf16.mxu0 %v1923_v56 }
  0x62   :  { %1805 = vmatprep.subr.bf16.mxu1 %v1924_v57 }
  0x63   :  { %1331 = vmatmul.mubr.bf16.vlgmr.msra.gmra.mrb[8].mxu0 %v1506_v52 }
  0x64   :  { %1372 = vmatmul.mubr.bf16.vlgmr.msra.gmra.mrb[8].mxu1 %v1508_v54  ;;  %1784 = vmatpush3.bf16.msra.mxu0 %v1925_v58 }
  0x65   :  { %1806 = vmatpush3.bf16.msra.mxu1 %v1926_v59  ;;  %1785 = vmatprep.subr.bf16.mxu0 %v1927_v60 }
  0x66   :  { %1807 = vmatprep.subr.bf16.mxu1 %v1928_v61  ;;  %1412 = vmatprep.mubr.bf16.mxu0 %v1511_v28 }
  0x67   :  { %1453 = vmatprep.mubr.bf16.mxu1 %v1513_v31 }
  0x68   :  { %1786 = vmatpush3.bf16.msra.mxu0 %v1929_v62 }
  0x69   :  { %1808 = vmatpush3.bf16.msra.mxu1 %v1930_v63  ;;  %1787 = vmatprep.subr.bf16.mxu0 %v1931_v0 }
  0x6a   :  { %1809 = vmatprep.subr.bf16.mxu1 %v1932_v1 }
  0x6c   :  { %1788 = vmatpush3.bf16.msra.mxu0 %v1933_v2 }
  0x6d   :  { %1810 = vmatpush3.bf16.msra.mxu1 %v1934_v3  ;;  %1789 = vmatprep.subr.bf16.mxu0 %v1935_v4 }
  0x6e   :  { %1811 = vmatprep.subr.bf16.mxu1 %v1936_v5 }
  0x70   :  { %1790 = vmatpush3.bf16.msra.mxu0 %v1937_v6 }
  0x71   :  { %1812 = vmatpush3.bf16.msra.mxu1 %v1938_v7  ;;  %1791 = vmatprep.subr.bf16.mxu0 %v1939_v8 }
  0x72   :  { %1813 = vmatprep.subr.bf16.mxu1 %v1940_v9 }
  0x74   :  { %1792 = vmatpush3.bf16.msra.mxu0 %v1941_v10 }
  0x75   :  { %1814 = vmatpush3.bf16.msra.mxu1 %v1942_v11  ;;  %1793 = vmatprep.subr.bf16.mxu0 %v1943_v12 }
  0x76   :  { %1815 = vmatprep.subr.bf16.mxu1 %v1944_v13 }
  0x78   :  { %1794 = vmatpush3.bf16.msra.mxu0 %v1945_v14 }
  0x79   :  { %1816 = vmatpush3.bf16.msra.mxu1 %v1946_v15  ;;  %1795 = vmatprep.subr.bf16.mxu0 %v1947_v16 }
  0x7a   :  { %1817 = vmatprep.subr.bf16.mxu1 %v1948_v17 }
  0x7c   :  { %1796 = vmatpush3.bf16.msra.mxu0 %v1949_v18 }
  0x7d   :  { %1818 = vmatpush3.bf16.msra.mxu1 %v1950_v19  ;;  %1797 = vmatprep.subr.bf16.mxu0 %v1951_v20 }
  0x7e   :  { %1819 = vmatprep.subr.bf16.mxu1 %v1952_v21 }
  0x80   :  { %1798 = vmatpush3.bf16.msra.mxu0 %v1953_v22 }
  0x81   :  { %1820 = vmatpush3.bf16.msra.mxu1 %v1954_v23 }
  0x83   :  { %1413 = vmatmul.mubr.bf16.vlgmr.msra.gmra.mrb[12].mxu0 %v1510_v27 }
  0x84   :  { %1454 = vmatmul.mubr.bf16.vlgmr.msra.gmra.mrb[12].mxu1 %v1512_v30 }
  0xf6   :  { %v1667_v32 = vpop.f32.mrb[0].mxu0 }
  0xf7   :  { %v1689_v33 = vpop.f32.mrb[0].mxu1  ;;  %v1668_v34 = vpop.f32.mrb[1].mxu0 }
  0xf8   :  { %v1669_v35 = vadd.f32 %v1668_v34, %v1667_v32  ;;  %v1690_v36 = vpop.f32.mrb[1].mxu1  ;;  %v1670_v37 = vpop.f32.mrb[2].mxu0 }
  0xf9   :  { %v1691_v38 = vadd.f32 %v1690_v36, %v1689_v33  ;;  %v1692_v39 = vpop.f32.mrb[2].mxu1  ;;  %v1671_v40 = vpop.f32.mrb[3].mxu0 }
  0xfa   :  { %v1672_v41 = vadd.f32 %v1671_v40, %v1670_v37  ;;  %v1693_v42 = vpop.f32.mrb[3].mxu1 }
  0xfb   :  { %v1210_v43 = vadd.f32 %v1691_v38, %v1669_v35  ;;  %v1694_v44 = vadd.f32 %v1693_v42, %v1692_v39 }
  0xfd   :  { %v1213_v45 = vadd.f32 %v1694_v44, %v1672_v41 }
 0x116   :  { %v1711_v46 = vpop.f32.mrb[4].mxu0 }
 0x117   :  { %v1733_v47 = vpop.f32.mrb[4].mxu1  ;;  %v1712_v48 = vpop.f32.mrb[5].mxu0 }
 0x118   :  { %v1713_v49 = vadd.f32 %v1712_v48, %v1711_v46  ;;  %v1734_v50 = vpop.f32.mrb[5].mxu1  ;;  %v1714_v51 = vpop.f32.mrb[6].mxu0 }
 0x119   :  { %v1735_v52 = vadd.f32 %v1734_v50, %v1733_v47  ;;  %v1736_v53 = vpop.f32.mrb[6].mxu1  ;;  %v1715_v54 = vpop.f32.mrb[7].mxu0 }
 0x11a   :  { %v1251_v55 = vadd.f32 %v1713_v49, %v1210_v43  ;;  %v1716_v56 = vadd.f32 %v1715_v54, %v1714_v51  ;;  %v1737_v57 = vpop.f32.mrb[7].mxu1 }
 0x11b   :  { %v1738_v58 = vadd.f32 %v1737_v57, %v1736_v53 }
 0x11c   :  { %v1292_v59 = vadd.f32 %v1735_v52, %v1251_v55  ;;  %v1254_v60 = vadd.f32 %v1716_v56, %v1213_v45 }
 0x11e   :  { %v1295_v61 = vadd.f32 %v1738_v58, %v1254_v60 }
 0x136   :  { %v1755_v62 = vpop.f32.mrb[8].mxu0 }
 0x137   :  { %v1777_v63 = vpop.f32.mrb[8].mxu1  ;;  %v1756_v0 = vpop.f32.mrb[9].mxu0 }
 0x138   :  { %v1778_v1 = vpop.f32.mrb[9].mxu1  ;;  %v1757_v2 = vadd.f32 %v1756_v0, %v1755_v62  ;;  %v1758_v4 = vpop.f32.mrb[10].mxu0 }
 0x139   :  { %v1779_v3 = vadd.f32 %v1778_v1, %v1777_v63  ;;  %v1780_v5 = vpop.f32.mrb[10].mxu1  ;;  %v1759_v6 = vpop.f32.mrb[11].mxu0 }
 0x13a   :  { %v1781_v7 = vpop.f32.mrb[11].mxu1  ;;  %v1333_v8 = vadd.f32 %v1757_v2, %v1292_v59  ;;  %v1760_v9 = vadd.f32 %v1759_v6, %v1758_v4 }
 0x13b   :  { %v1782_v10 = vadd.f32 %v1781_v7, %v1780_v5 }
 0x13c   :  { %v1374_v11 = vadd.f32 %v1779_v3, %v1333_v8  ;;  %v1336_v12 = vadd.f32 %v1760_v9, %v1295_v61 }
 0x13e   :  { %v1377_v13 = vadd.f32 %v1782_v10, %v1336_v12 }
 0x156   :  { %v1799_v14 = vpop.f32.mrb[12].mxu0 }
 0x157   :  { %v1821_v15 = vpop.f32.mrb[12].mxu1  ;;  %v1800_v16 = vpop.f32.mrb[13].mxu0 }
 0x158   :  { %v1801_v17 = vadd.f32 %v1800_v16, %v1799_v14  ;;  %v1822_v18 = vpop.f32.mrb[13].mxu1  ;;  %v1802_v19 = vpop.f32.mrb[14].mxu0 }
 0x159   :  { %v1823_v20 = vadd.f32 %v1822_v18, %v1821_v15  ;;  %v1824_v21 = vpop.f32.mrb[14].mxu1  ;;  %v1803_v22 = vpop.f32.mrb[15].mxu0 }
 0x15a   :  { %v1415_v23 = vadd.f32 %v1801_v17, %v1374_v11  ;;  %v1804_v24 = vadd.f32 %v1803_v22, %v1802_v19  ;;  %v1825_v25 = vpop.f32.mrb[15].mxu1 }
 0x15b   :  { %v1826_v26 = vadd.f32 %v1825_v25, %v1824_v21 }
 0x15c   :  { %v1456_v27 = vadd.f32 %v1823_v20, %v1415_v23  ;;  %v1418_v28 = vadd.f32 %v1804_v24, %v1377_v13 }
 0x15e   :  { %v1459_v29 = vadd.f32 %v1826_v26, %v1418_v28  ;;  %v1480_v30 = vmul.f32 %v1456_v27, %v1456_v27 }
 0x160   :  { %v1649_v31 = vpack.c.bf16 %v1459_v29, %v1456_v27  ;;  %v1472_v32 = vadd.f32 %v1459_v29, %v1456_v27  ;;  %v1481_v33 = vmul.f32 %v1459_v29, %v1459_v29 }
 0x162   :  { %1650 = vst [vmem:[%s2418_s2] sm:$0xff] %v1649_v31   ;;  %v1473_v34 = vrot.slane %v1472_v32, 4  ;;  %v1482_v35 = vadd.f32 %v1481_v33, %v1480_v30 }
 0x164   :  { %v1474_v36 = vadd.f32 %v1473_v34, %v1472_v32  ;;  %v1483_v37 = vrot.slane %v1482_v35, 4 }
 0x166   :  { %v1475_v38 = vrot.slane %v1474_v36, 2  ;;  %v1484_v39 = vadd.f32 %v1483_v37, %v1482_v35 }
 0x168   :  { %v1476_v40 = vadd.f32 %v1475_v38, %v1474_v36  ;;  %v1485_v41 = vrot.slane %v1484_v39, 2 }
 0x16a   :  { %v1477_v42 = vrot.slane %v1476_v40, 1  ;;  %v1486_v43 = vadd.f32 %v1485_v41, %v1484_v39 }
 0x16c   :  { %v1478_v44 = vadd.f32 %v1477_v42, %v1476_v40  ;;  %v1487_v45 = vrot.slane %v1486_v43, 1 }
 0x16e   :  { %1479 = vst [vmem:[%s2419_s3] sm:$0x1] %v1478_v44  ;;  %v1488_v46 = vadd.f32 %v1487_v45, %v1486_v43 }
 0x170   :  { %1489 = vst [vmem:[%s2419_s3 + $0x1] sm:$0x1] %v1488_v46 }

// kernel: discriminator_forward.15
= control target key start
LH: loop header
LB: loop body
LE: loop exit
PB: predicated region body
PF: predicated region fallthrough
CT: control target
= control target key end

     0   :  { %vm26_vm0 = vcmask 1041408   ;;  %vm44_vm1 = vcmask 1024   ;;  %s89_s0 = inlined_call_operand.vmem [shape: bf16[2,128], index: 0, kind: input, shape index: {}]   ;;  %s90_s1 = inlined_call_operand.vmem [shape: f32[1,128], index: 1, kind: input, shape index: {}]   ;;  %s91_s2 = inlined_call_operand.<no memory space> [shape: f32[1,1], index: 2, kind: input, shape index: {}]   ;;  %s92_s3 = inlined_call_operand.vmem [shape: f32[2,1], index: 3, kind: output, shape index: {}]  }
   0x1   :  { %v16_v0 = vld [vmem:[%s89_s0] sm:$0x1]  ;;  %v8_v2 = vstv %s91_s2 }
   0x2   :  { %v50_v1 = vld [vmem:[%s90_s1] ss:$0 sm:$0xff]  ;;  %v17_v3 = vunpack.c.l.bf16 %v16_v0  ;;  %9 = vst [vmem:[#allocation2] sm:$0x1] %v8_v2 }
   0x4   :  { %v25_v4 = vmul.f32 %v50_v1, %v17_v3 }
   0x6   :  { %v27_v5 = vsel %vm26_vm0, %v25_v4, 0.0 }
   0x7   :  { %28 = vadd.xlane.f32.xlu0 %v27_v5 }
   0x9   :  { %v51_v6 = vld [vmem:[#allocation2] ss:$0 sm:$0xff] }
  0x94   :  { %v29_v7 = vpop.xlane.xlu0 %28 }
  0x95   :  { %v37_v8 = vadd.f32 %v51_v6, %v29_v7 }
  0x97   :  { %v52_v9 = vmul.f32 -1.442695, %v37_v8 }
  0x99   :  { %53 = vpow2.f32 %v52_v9 }
  0xa3   :  { %v54_v10 = vpop.eup %53 }
  0xa4   :  { %v41_v11 = vadd.f32 1.0, %v54_v10 }
  0xa6   :  { %55 = vrcp.f32 %v41_v11 }
  0xb0   :  { %v56_v12 = vpop.eup %55 }
  0xb1   :  { %45 = vst.msk [vmem:[%s92_s3] sm:$0x3] %vm44_vm1, %v56_v12 }

</bundles_post_ra>
